<compile_context>
chip_gen: v6e
topology: v6e:2x2x1
jax: 0.10.0
libtpu: 0.0.40
codegen_flags: <defaults>
</compile_context>

<pallas_src>
import functools
import math

import jax
import jax.numpy as jnp
from jax.experimental import pallas as pl
from jax.experimental.pallas import tpu as pltpu


# ------------------------------ fused kernel --------------------------------

def _model_kernel(src_ref, pos_ref, in_w_ref, in_b_ref,
                  qkv_w_ref, qkv_b_ref, out_w_ref, out_b_ref,
                  ln1_g_ref, ln1_b_ref, ff1_w_ref, ff1_b_ref,
                  ff2_w_ref, ff2_b_ref, ln2_g_ref, ln2_b_ref,
                  cls1_w_ref, cls1_b_ref, cls2_w_ref, cls2_b_ref,
                  o_ref, x_vmem, *, TB, S, H, eps):
    layer = pl.program_id(1)
    n_layers = pl.num_programs(1)

    # ---- step 0 (per batch tile): input projection + positional encoding ----
    @pl.when(layer == 0)
    def _():
        x0 = jnp.dot(src_ref[...], in_w_ref[...],
                     preferred_element_type=jnp.float32) + in_b_ref[...]
        x_vmem[...] = x0 + jnp.tile(pos_ref[...], (TB, 1))

    x = x_vmem[...]                                   # [TB*S, D] f32, resident
    D = x.shape[-1]
    Dh = D // H
    w_dt = qkv_w_ref.dtype                            # bf16 weight dtype

    # ---- multi-head self-attention: one batched contraction ----
    qkv = jnp.dot(x.astype(w_dt), qkv_w_ref[...],
                  preferred_element_type=jnp.float32) + qkv_b_ref[...]  # [TB*S, 3D]

    def split_heads(t):                               # [TB*S, D] -> [H*TB, S, Dh]
        return jnp.concatenate(
            [t[:, h * Dh:(h + 1) * Dh].reshape(TB, S, Dh) for h in range(H)],
            axis=0)

    qs = split_heads(qkv[:, :D])                      # scale pre-folded into W_q
    ks = split_heads(qkv[:, D:2 * D])
    vs = split_heads(qkv[:, 2 * D:])

    s = jnp.einsum('bqd,bkd->bqk', qs, ks,
                   preferred_element_type=jnp.float32)          # [H*TB, S, S]
    p = jnp.exp(s - jnp.max(s, axis=-1, keepdims=True))
    p = p * pl.reciprocal(jnp.sum(p, axis=-1, keepdims=True), approx=True)
    o = jnp.einsum('bqk,bkd->bqd', p, vs,
                   preferred_element_type=jnp.float32)          # [H*TB, S, Dh]

    # merge heads back to [TB*S, D] and do ONE output projection (K = D)
    o = jnp.concatenate(
        [o[h * TB:(h + 1) * TB].reshape(TB * S, Dh) for h in range(H)], axis=-1)
    attn = jnp.dot(o.astype(w_dt), out_w_ref[...],
                   preferred_element_type=jnp.float32) + out_b_ref[...]

    # ---- residual + LayerNorm1 (fused, f32 stats) ----
    x = x + attn
    mu = jnp.mean(x, axis=-1, keepdims=True)
    var = jnp.mean((x - mu) ** 2, axis=-1, keepdims=True)
    x = (x - mu) * jax.lax.rsqrt(var + eps) * ln1_g_ref[...] + ln1_b_ref[...]

    # ---- feed-forward (ReLU) + residual + LayerNorm2 (fused) ----
    f = jnp.dot(x.astype(w_dt), ff1_w_ref[...],
                preferred_element_type=jnp.float32) + ff1_b_ref[...]
    f = jnp.maximum(f, 0.0)
    f = jnp.dot(f.astype(w_dt), ff2_w_ref[...],
                preferred_element_type=jnp.float32) + ff2_b_ref[...]
    x = x + f
    mu = jnp.mean(x, axis=-1, keepdims=True)
    var = jnp.mean((x - mu) ** 2, axis=-1, keepdims=True)
    x = (x - mu) * jax.lax.rsqrt(var + eps) * ln2_g_ref[...] + ln2_b_ref[...]

    x_vmem[...] = x

    # ---- last step: strided last-token read + classifier head ----
    @pl.when(layer == n_layers - 1)
    def _():
        # last token of every sequence in this batch tile (no one-hot matmul)
        last = x_vmem[pl.ds(S - 1, TB, stride=S), :]            # [TB, D]
        h1 = jnp.dot(last, cls1_w_ref[...],
                     preferred_element_type=jnp.float32) + cls1_b_ref[...]
        h1 = jnp.maximum(h1, 0.0)
        logits = jnp.dot(h1, cls2_w_ref[...],
                         preferred_element_type=jnp.float32) + cls2_b_ref[...]
        o_ref[...] = logits.astype(o_ref.dtype)


# ------------------------------ jitted wrapper -------------------------------

@functools.partial(jax.jit, static_argnames=("nhead", "batch_tile"))
def trading_transformer_forward(params, src, *, nhead, batch_tile=None):
    """src: [B, S, num_features] -> logits [B, num_classes]."""
    B, S, F = src.shape
    D = params["in_w"].shape[1]
    L = params["qkv_w"].shape[0]
    C = params["cls2_w"].shape[1]

    TB = B if batch_tile is None else batch_tile      # batch-tile size
    assert B % TB == 0
    NB = B // TB                                      # number of batch tiles

    src2d = src.reshape(B * S, F)          # free wrapper reshape (row-major)
    pos = params["pos_emb"][:S]            # [S, D] static slice

    same = lambda b, l: (0, 0)
    per_layer = lambda b, l: (l, 0, 0)
    per_batch = lambda b, l: (b, 0)
    sq = pl.Squeezed()

    grid_spec = pltpu.PrefetchScalarGridSpec(
        num_scalar_prefetch=0,
        grid=(NB, L),                                  # (batch tiles, layers)
        in_specs=[
            pl.BlockSpec((TB * S, F), per_batch),       # src2d
            pl.BlockSpec((S, D), same),                 # pos
            pl.BlockSpec((F, D), same),                 # in_w
            pl.BlockSpec((1, D), same),                 # in_b
            pl.BlockSpec((sq, D, 3 * D), per_layer),    # qkv_w   (bf16)
            pl.BlockSpec((sq, 1, 3 * D), per_layer),    # qkv_b
            pl.BlockSpec((sq, D, D), per_layer),        # out_w   (bf16)
            pl.BlockSpec((sq, 1, D), per_layer),        # out_b
            pl.BlockSpec((sq, 1, D), per_layer),        # ln1_g
            pl.BlockSpec((sq, 1, D), per_layer),        # ln1_b
            pl.BlockSpec((sq, D, 4 * D), per_layer),    # ff1_w   (bf16)
            pl.BlockSpec((sq, 1, 4 * D), per_layer),    # ff1_b
            pl.BlockSpec((sq, 4 * D, D), per_layer),    # ff2_w   (bf16)
            pl.BlockSpec((sq, 1, D), per_layer),        # ff2_b
            pl.BlockSpec((sq, 1, D), per_layer),        # ln2_g
            pl.BlockSpec((sq, 1, D), per_layer),        # ln2_b
            pl.BlockSpec((D, D // 2), same),            # cls1_w
            pl.BlockSpec((1, D // 2), same),            # cls1_b
            pl.BlockSpec((D // 2, C), same),            # cls2_w
            pl.BlockSpec((1, C), same),                 # cls2_b
        ],
        out_specs=pl.BlockSpec((TB, C), per_batch),
        scratch_shapes=[pltpu.VMEM((TB * S, D), jnp.float32)],
    )

    return pl.pallas_call(
        functools.partial(_model_kernel, TB=TB, S=S, H=nhead, eps=1e-5),
        out_shape=jax.ShapeDtypeStruct((B, C), jnp.float32),
        grid_spec=grid_spec,
        compiler_params=pltpu.CompilerParams(
            dimension_semantics=("parallel", "arbitrary"),  # batch || , layers seq
            vmem_limit_bytes=32 * 1024 * 1024),
    )(src2d, pos, params["in_w"], params["in_b"],
      params["qkv_w"], params["qkv_b"], params["out_w"], params["out_b"],
      params["ln1_g"], params["ln1_b"], params["ff1_w"], params["ff1_b"],
      params["ff2_w"], params["ff2_b"], params["ln2_g"], params["ln2_b"],
      params["cls1_w"], params["cls1_b"], params["cls2_w"], params["cls2_b"])


# ------------------------------ parameter init -------------------------------

def init_params(key, num_features, num_classes=3, d_model=32, nhead=4,
                num_layers=2, max_len=64, weight_dtype=jnp.bfloat16):
    def dense(k, fin, fout):
        kw, kb = jax.random.split(k)
        return (jax.random.normal(kw, (fin, fout), jnp.float32) * 0.02,
                jax.random.normal(kb, (1, fout), jnp.float32) * 0.02)

    keys = jax.random.split(key, 4 + num_layers)
    p = {}
    p["in_w"], p["in_b"] = dense(keys[0], num_features, d_model)
    p["pos_emb"] = jax.random.normal(keys[1], (max_len, d_model),
                                     jnp.float32) * 0.02
    p["cls1_w"], p["cls1_b"] = dense(keys[2], d_model, d_model // 2)
    p["cls2_w"], p["cls2_b"] = dense(keys[3], d_model // 2, num_classes)

    # 1/sqrt(Dh) softmax scale folded into the Q block of qkv_w / qkv_b
    scale = 1.0 / math.sqrt(d_model // nhead)

    qkv_w, qkv_b, out_w, out_b = [], [], [], []
    ff1_w, ff1_b, ff2_w, ff2_b = [], [], [], []
    for li in range(num_layers):
        lk = jax.random.split(keys[4 + li], 4)
        w, b = dense(lk[0], d_model, 3 * d_model)
        w = w.at[:, :d_model].multiply(scale)
        b = b.at[:, :d_model].multiply(scale)
        qkv_w.append(w); qkv_b.append(b)
        w, b = dense(lk[1], d_model, d_model);     out_w.append(w); out_b.append(b)
        w, b = dense(lk[2], d_model, 4 * d_model); ff1_w.append(w); ff1_b.append(b)
        w, b = dense(lk[3], 4 * d_model, d_model); ff2_w.append(w); ff2_b.append(b)

    # stacked per-layer matmul weights in bf16 (halved DMA bytes, native MXU rate)
    p["qkv_w"] = jnp.stack(qkv_w).astype(weight_dtype)
    p["qkv_b"] = jnp.stack(qkv_b)
    p["out_w"] = jnp.stack(out_w).astype(weight_dtype)
    p["out_b"] = jnp.stack(out_b)
    p["ff1_w"] = jnp.stack(ff1_w).astype(weight_dtype)
    p["ff1_b"] = jnp.stack(ff1_b)
    p["ff2_w"] = jnp.stack(ff2_w).astype(weight_dtype)
    p["ff2_b"] = jnp.stack(ff2_b)
    p["ln1_g"] = jnp.ones((num_layers, 1, d_model), jnp.float32)
    p["ln1_b"] = jnp.zeros((num_layers, 1, d_model), jnp.float32)
    p["ln2_g"] = jnp.ones((num_layers, 1, d_model), jnp.float32)
    p["ln2_b"] = jnp.zeros((num_layers, 1, d_model), jnp.float32)
    return p


# ----------------------------------- main ------------------------------------

if __name__ == "__main__":
    B, S, F = 2, 8, 16            # batch, seq, num_features
    D, H, L, C = 32, 4, 2, 3      # d_model, nhead, num_layers, num_classes

    key = jax.random.PRNGKey(0)
    pkey, xkey = jax.random.split(key)
    params = init_params(pkey, num_features=F, num_classes=C,
                         d_model=D, nhead=H, num_layers=L)
    src = jax.random.normal(xkey, (B, S, F), jnp.float32)

    # single batch tile at toy size; on v7x with larger B pass batch_tile < B
    out = trading_transformer_forward(params, src, nhead=H)
    out = jax.block_until_ready(out)
    assert out.shape == (B, C), out.shape
    assert bool(jnp.all(jnp.isfinite(out)))
    print("KERNEL_OK")
</pallas_src>

<mosaic_0001>
module attributes {stable_mosaic.version = 11 : i64} {
  func.func @_model_kernel(%arg0: i32, %arg1: i32, %arg2: memref<16x16xf32, #tpu.memory_space<vmem>>, %arg3: memref<8x32xf32, #tpu.memory_space<vmem>>, %arg4: memref<16x32xf32, #tpu.memory_space<vmem>>, %arg5: memref<1x32xf32, #tpu.memory_space<vmem>>, %arg6: memref<1x32x96xbf16, #tpu.memory_space<vmem>>, %arg7: memref<1x1x96xf32, #tpu.memory_space<vmem>>, %arg8: memref<1x32x32xbf16, #tpu.memory_space<vmem>>, %arg9: memref<1x1x32xf32, #tpu.memory_space<vmem>>, %arg10: memref<1x1x32xf32, #tpu.memory_space<vmem>>, %arg11: memref<1x1x32xf32, #tpu.memory_space<vmem>>, %arg12: memref<1x32x128xbf16, #tpu.memory_space<vmem>>, %arg13: memref<1x1x128xf32, #tpu.memory_space<vmem>>, %arg14: memref<1x128x32xbf16, #tpu.memory_space<vmem>>, %arg15: memref<1x1x32xf32, #tpu.memory_space<vmem>>, %arg16: memref<1x1x32xf32, #tpu.memory_space<vmem>>, %arg17: memref<1x1x32xf32, #tpu.memory_space<vmem>>, %arg18: memref<32x16xf32, #tpu.memory_space<vmem>>, %arg19: memref<1x16xf32, #tpu.memory_space<vmem>>, %arg20: memref<16x3xf32, #tpu.memory_space<vmem>>, %arg21: memref<1x3xf32, #tpu.memory_space<vmem>>, %arg22: memref<2x3xf32, #tpu.memory_space<vmem>>, %arg23: memref<16x32xf32, #tpu.memory_space<vmem>>) attributes {dimension_semantics = [#tpu.dimension_semantics<parallel>, #tpu.dimension_semantics<arbitrary>], iteration_bounds = array<i64: 1, 2>, scalar_prefetch = 0 : i64, scratch_operands = 1 : i64, tpu.core_type = #tpu.core_type<tc>, window_params = [{transform_indices = @transform_0, window_bounds = array<i64: 16, 16>}, {pipeline_mode = #tpu.pipeline_mode<synchronous>, transform_indices = @transform_1, window_bounds = array<i64: 8, 32>}, {pipeline_mode = #tpu.pipeline_mode<synchronous>, transform_indices = @transform_2, window_bounds = array<i64: 16, 32>}, {pipeline_mode = #tpu.pipeline_mode<synchronous>, transform_indices = @transform_3, window_bounds = array<i64: 1, 32>}, {transform_indices = @transform_4, window_bounds = array<i64: 1, 32, 96>}, {transform_indices = @transform_5, window_bounds = array<i64: 1, 1, 96>}, {transform_indices = @transform_6, window_bounds = array<i64: 1, 32, 32>}, {transform_indices = @transform_7, window_bounds = array<i64: 1, 1, 32>}, {transform_indices = @transform_8, window_bounds = array<i64: 1, 1, 32>}, {transform_indices = @transform_9, window_bounds = array<i64: 1, 1, 32>}, {transform_indices = @transform_10, window_bounds = array<i64: 1, 32, 128>}, {transform_indices = @transform_11, window_bounds = array<i64: 1, 1, 128>}, {transform_indices = @transform_12, window_bounds = array<i64: 1, 128, 32>}, {transform_indices = @transform_13, window_bounds = array<i64: 1, 1, 32>}, {transform_indices = @transform_14, window_bounds = array<i64: 1, 1, 32>}, {transform_indices = @transform_15, window_bounds = array<i64: 1, 1, 32>}, {pipeline_mode = #tpu.pipeline_mode<synchronous>, transform_indices = @transform_16, window_bounds = array<i64: 32, 16>}, {pipeline_mode = #tpu.pipeline_mode<synchronous>, transform_indices = @transform_17, window_bounds = array<i64: 1, 16>}, {pipeline_mode = #tpu.pipeline_mode<synchronous>, transform_indices = @transform_18, window_bounds = array<i64: 16, 3>}, {pipeline_mode = #tpu.pipeline_mode<synchronous>, transform_indices = @transform_19, window_bounds = array<i64: 1, 3>}, {transform_indices = @transform_20, window_bounds = array<i64: 2, 3>}]} {
    %c0_i32 = arith.constant 0 : i32
    %0 = arith.cmpi eq, %arg1, %c0_i32 : i32
    %1 = arith.extui %0 : i1 to i32
    %c0_i32_0 = arith.constant 0 : i32
    %2 = arith.cmpi ne, %1, %c0_i32_0 : i32
    scf.if %2 {
      %c0_59 = arith.constant 0 : index
      %c0_60 = arith.constant 0 : index
      %147 = vector.load %arg2[%c0_59, %c0_60] : memref<16x16xf32, #tpu.memory_space<vmem>>, vector<16x16xf32>
      %c0_61 = arith.constant 0 : index
      %c0_62 = arith.constant 0 : index
      %148 = vector.load %arg4[%c0_61, %c0_62] : memref<16x32xf32, #tpu.memory_space<vmem>>, vector<16x32xf32>
      %cst_63 = arith.constant dense<0.000000e+00> : vector<16x32xf32>
      %149 = tpu.matmul %147, %148, %cst_63 {dimension_numbers = #tpu.dot_dimension_numbers<[1], [0], [0], [1], [0, 0, 1, 1], [], []>} : vector<16x16xf32>, vector<16x32xf32>, vector<16x32xf32> -> vector<16x32xf32>
      %c0_64 = arith.constant 0 : index
      %c0_65 = arith.constant 0 : index
      %150 = vector.load %arg5[%c0_64, %c0_65] : memref<1x32xf32, #tpu.memory_space<vmem>>, vector<1x32xf32>
      %151 = vector.broadcast %150 : vector<1x32xf32> to vector<16x32xf32>
      %152 = arith.addf %149, %151 : vector<16x32xf32>
      %c0_66 = arith.constant 0 : index
      %c0_67 = arith.constant 0 : index
      %153 = vector.load %arg3[%c0_66, %c0_67] : memref<8x32xf32, #tpu.memory_space<vmem>>, vector<8x32xf32>
      %154 = tpu.concatenate %153, %153 in 0 : vector<8x32xf32>, vector<8x32xf32> -> vector<16x32xf32>
      %155 = arith.addf %152, %154 : vector<16x32xf32>
      %c0_68 = arith.constant 0 : index
      %c0_69 = arith.constant 0 : index
      %156 = vector.load %arg23[%c0_68, %c0_69] : memref<16x32xf32, #tpu.memory_space<vmem>>, vector<16x32xf32>
      tpu.vector_store %arg23[%c0_68, %c0_69], %155 {strides = array<i32>} : memref<16x32xf32, #tpu.memory_space<vmem>>, vector<16x32xf32>,
    } else {
    }
    %c0 = arith.constant 0 : index
    %c0_1 = arith.constant 0 : index
    %3 = vector.load %arg23[%c0, %c0_1] : memref<16x32xf32, #tpu.memory_space<vmem>>, vector<16x32xf32>
    %4 = arith.truncf %3 : vector<16x32xf32> to vector<16x32xbf16>
    %c0_2 = arith.constant 0 : index
    %c0_3 = arith.constant 0 : index
    %c0_4 = arith.constant 0 : index
    %5 = vector.load %arg6[%c0_2, %c0_3, %c0_4] : memref<1x32x96xbf16, #tpu.memory_space<vmem>>, vector<1x32x96xbf16>
    %6 = vector.shape_cast %5 : vector<1x32x96xbf16> to vector<32x96xbf16>
    %cst = arith.constant dense<0.000000e+00> : vector<16x96xf32>
    %7 = tpu.matmul %4, %6, %cst {dimension_numbers = #tpu.dot_dimension_numbers<[1], [0], [0], [1], [0, 0, 1, 1], [], []>} : vector<16x32xbf16>, vector<32x96xbf16>, vector<16x96xf32> -> vector<16x96xf32>
    %c0_5 = arith.constant 0 : index
    %c0_6 = arith.constant 0 : index
    %c0_7 = arith.constant 0 : index
    %8 = vector.load %arg7[%c0_5, %c0_6, %c0_7] : memref<1x1x96xf32, #tpu.memory_space<vmem>>, vector<1x1x96xf32>
    %9 = vector.shape_cast %8 : vector<1x1x96xf32> to vector<1x96xf32>
    %10 = vector.broadcast %9 : vector<1x96xf32> to vector<16x96xf32>
    %11 = arith.addf %7, %10 : vector<16x96xf32>
    %12 = vector.extract_strided_slice %11 {offsets = [0, 0], sizes = [16, 32], strides = [1, 1]} : vector<16x96xf32> to vector<16x32xf32>
    %13 = vector.extract_strided_slice %12 {offsets = [0, 0], sizes = [16, 8], strides = [1, 1]} : vector<16x32xf32> to vector<16x8xf32>
    %14 = vector.shape_cast %13 : vector<16x8xf32> to vector<2x8x8xf32>
    %15 = vector.extract_strided_slice %12 {offsets = [0, 8], sizes = [16, 8], strides = [1, 1]} : vector<16x32xf32> to vector<16x8xf32>
    %16 = vector.shape_cast %15 : vector<16x8xf32> to vector<2x8x8xf32>
    %17 = vector.extract_strided_slice %12 {offsets = [0, 16], sizes = [16, 8], strides = [1, 1]} : vector<16x32xf32> to vector<16x8xf32>
    %18 = vector.shape_cast %17 : vector<16x8xf32> to vector<2x8x8xf32>
    %19 = vector.extract_strided_slice %12 {offsets = [0, 24], sizes = [16, 8], strides = [1, 1]} : vector<16x32xf32> to vector<16x8xf32>
    %20 = vector.shape_cast %19 : vector<16x8xf32> to vector<2x8x8xf32>
    %21 = tpu.concatenate %14, %16, %18, %20 in 0 : vector<2x8x8xf32>, vector<2x8x8xf32>, vector<2x8x8xf32>, vector<2x8x8xf32> -> vector<8x8x8xf32>
    %22 = vector.extract_strided_slice %11 {offsets = [0, 32], sizes = [16, 32], strides = [1, 1]} : vector<16x96xf32> to vector<16x32xf32>
    %23 = vector.extract_strided_slice %22 {offsets = [0, 0], sizes = [16, 8], strides = [1, 1]} : vector<16x32xf32> to vector<16x8xf32>
    %24 = vector.shape_cast %23 : vector<16x8xf32> to vector<2x8x8xf32>
    %25 = vector.extract_strided_slice %22 {offsets = [0, 8], sizes = [16, 8], strides = [1, 1]} : vector<16x32xf32> to vector<16x8xf32>
    %26 = vector.shape_cast %25 : vector<16x8xf32> to vector<2x8x8xf32>
    %27 = vector.extract_strided_slice %22 {offsets = [0, 16], sizes = [16, 8], strides = [1, 1]} : vector<16x32xf32> to vector<16x8xf32>
    %28 = vector.shape_cast %27 : vector<16x8xf32> to vector<2x8x8xf32>
    %29 = vector.extract_strided_slice %22 {offsets = [0, 24], sizes = [16, 8], strides = [1, 1]} : vector<16x32xf32> to vector<16x8xf32>
    %30 = vector.shape_cast %29 : vector<16x8xf32> to vector<2x8x8xf32>
    %31 = tpu.concatenate %24, %26, %28, %30 in 0 : vector<2x8x8xf32>, vector<2x8x8xf32>, vector<2x8x8xf32>, vector<2x8x8xf32> -> vector<8x8x8xf32>
    %32 = vector.extract_strided_slice %11 {offsets = [0, 64], sizes = [16, 32], strides = [1, 1]} : vector<16x96xf32> to vector<16x32xf32>
    %33 = vector.extract_strided_slice %32 {offsets = [0, 0], sizes = [16, 8], strides = [1, 1]} : vector<16x32xf32> to vector<16x8xf32>
    %34 = vector.shape_cast %33 : vector<16x8xf32> to vector<2x8x8xf32>
    %35 = vector.extract_strided_slice %32 {offsets = [0, 8], sizes = [16, 8], strides = [1, 1]} : vector<16x32xf32> to vector<16x8xf32>
    %36 = vector.shape_cast %35 : vector<16x8xf32> to vector<2x8x8xf32>
    %37 = vector.extract_strided_slice %32 {offsets = [0, 16], sizes = [16, 8], strides = [1, 1]} : vector<16x32xf32> to vector<16x8xf32>
    %38 = vector.shape_cast %37 : vector<16x8xf32> to vector<2x8x8xf32>
    %39 = vector.extract_strided_slice %32 {offsets = [0, 24], sizes = [16, 8], strides = [1, 1]} : vector<16x32xf32> to vector<16x8xf32>
    %40 = vector.shape_cast %39 : vector<16x8xf32> to vector<2x8x8xf32>
    %41 = tpu.concatenate %34, %36, %38, %40 in 0 : vector<2x8x8xf32>, vector<2x8x8xf32>, vector<2x8x8xf32>, vector<2x8x8xf32> -> vector<8x8x8xf32>
    "tpu.trace_start"() <{level = 10 : i32, message = "bqd,bkd->bqk"}> : () -> ()
    %cst_8 = arith.constant dense<0.000000e+00> : vector<8x8x8xf32>
    %42 = tpu.matmul %21, %31, %cst_8 {dimension_numbers = #tpu.dot_dimension_numbers<[2], [2], [1], [1], [0, 0, 0, 1, 1, 1], [0], [0]>} : vector<8x8x8xf32>, vector<8x8x8xf32>, vector<8x8x8xf32> -> vector<8x8x8xf32>
    "tpu.trace_stop"() : () -> ()
    %cst_9 = arith.constant dense<0xFF800000> : vector<8x8xf32>
    %43 = vector.multi_reduction <maximumf>, %42, %cst_9 [2] : vector<8x8x8xf32> to vector<8x8xf32>
    %44 = vector.shape_cast %43 : vector<8x8xf32> to vector<8x8x1xf32>
    %45 = vector.broadcast %44 : vector<8x8x1xf32> to vector<8x8x8xf32>
    %46 = arith.subf %42, %45 : vector<8x8x8xf32>
    %47 = math.exp %46 : vector<8x8x8xf32>
    %cst_10 = arith.constant dense<0.000000e+00> : vector<8x8xf32>
    %48 = vector.multi_reduction <add>, %47, %cst_10 [2] : vector<8x8x8xf32> to vector<8x8xf32>
    %49 = vector.shape_cast %48 : vector<8x8xf32> to vector<8x8x1xf32>
    %50 = tpu.reciprocal %49 {approx = true} : vector<8x8x1xf32> -> vector<8x8x1xf32>
    %51 = vector.broadcast %50 : vector<8x8x1xf32> to vector<8x8x8xf32>
    %52 = arith.mulf %47, %51 : vector<8x8x8xf32>
    "tpu.trace_start"() <{level = 10 : i32, message = "bqk,bkd->bqd"}> : () -> ()
    %cst_11 = arith.constant dense<0.000000e+00> : vector<8x8x8xf32>
    %53 = tpu.matmul %52, %41, %cst_11 {dimension_numbers = #tpu.dot_dimension_numbers<[2], [1], [1], [2], [0, 0, 0, 1, 1, 2], [0], [0]>} : vector<8x8x8xf32>, vector<8x8x8xf32>, vector<8x8x8xf32> -> vector<8x8x8xf32>
    "tpu.trace_stop"() : () -> ()
    %54 = vector.extract_strided_slice %53 {offsets = [0, 0, 0], sizes = [2, 8, 8], strides = [1, 1, 1]} : vector<8x8x8xf32> to vector<2x8x8xf32>
    %55 = vector.shape_cast %54 : vector<2x8x8xf32> to vector<16x8xf32>
    %56 = vector.extract_strided_slice %53 {offsets = [2, 0, 0], sizes = [2, 8, 8], strides = [1, 1, 1]} : vector<8x8x8xf32> to vector<2x8x8xf32>
    %57 = vector.shape_cast %56 : vector<2x8x8xf32> to vector<16x8xf32>
    %58 = vector.extract_strided_slice %53 {offsets = [4, 0, 0], sizes = [2, 8, 8], strides = [1, 1, 1]} : vector<8x8x8xf32> to vector<2x8x8xf32>
    %59 = vector.shape_cast %58 : vector<2x8x8xf32> to vector<16x8xf32>
    %60 = vector.extract_strided_slice %53 {offsets = [6, 0, 0], sizes = [2, 8, 8], strides = [1, 1, 1]} : vector<8x8x8xf32> to vector<2x8x8xf32>
    %61 = vector.shape_cast %60 : vector<2x8x8xf32> to vector<16x8xf32>
    %62 = tpu.concatenate %55, %57, %59, %61 in 1 : vector<16x8xf32>, vector<16x8xf32>, vector<16x8xf32>, vector<16x8xf32> -> vector<16x32xf32>
    %63 = arith.truncf %62 : vector<16x32xf32> to vector<16x32xbf16>
    %c0_12 = arith.constant 0 : index
    %c0_13 = arith.constant 0 : index
    %c0_14 = arith.constant 0 : index
    %64 = vector.load %arg8[%c0_12, %c0_13, %c0_14] : memref<1x32x32xbf16, #tpu.memory_space<vmem>>, vector<1x32x32xbf16>
    %65 = vector.shape_cast %64 : vector<1x32x32xbf16> to vector<32x32xbf16>
    %cst_15 = arith.constant dense<0.000000e+00> : vector<16x32xf32>
    %66 = tpu.matmul %63, %65, %cst_15 {dimension_numbers = #tpu.dot_dimension_numbers<[1], [0], [0], [1], [0, 0, 1, 1], [], []>} : vector<16x32xbf16>, vector<32x32xbf16>, vector<16x32xf32> -> vector<16x32xf32>
    %c0_16 = arith.constant 0 : index
    %c0_17 = arith.constant 0 : index
    %c0_18 = arith.constant 0 : index
    %67 = vector.load %arg9[%c0_16, %c0_17, %c0_18] : memref<1x1x32xf32, #tpu.memory_space<vmem>>, vector<1x1x32xf32>
    %68 = vector.shape_cast %67 : vector<1x1x32xf32> to vector<1x32xf32>
    %69 = vector.broadcast %68 : vector<1x32xf32> to vector<16x32xf32>
    %70 = arith.addf %66, %69 : vector<16x32xf32>
    %71 = arith.addf %3, %70 : vector<16x32xf32>
    %cst_19 = arith.constant dense<0.000000e+00> : vector<16xf32>
    %72 = vector.multi_reduction <add>, %71, %cst_19 [1] : vector<16x32xf32> to vector<16xf32>
    %73 = vector.shape_cast %72 : vector<16xf32> to vector<16x1xf32>
    %cst_20 = arith.constant 3.200000e+01 : f32
    %74 = vector.broadcast %cst_20 : f32 to vector<16x1xf32>
    %75 = arith.divf %73, %74 : vector<16x1xf32>
    %76 = vector.broadcast %75 : vector<16x1xf32> to vector<16x32xf32>
    %77 = arith.subf %71, %76 : vector<16x32xf32>
    %78 = arith.mulf %77, %77 : vector<16x32xf32>
    %cst_21 = arith.constant dense<0.000000e+00> : vector<16xf32>
    %79 = vector.multi_reduction <add>, %78, %cst_21 [1] : vector<16x32xf32> to vector<16xf32>
    %80 = vector.shape_cast %79 : vector<16xf32> to vector<16x1xf32>
    %cst_22 = arith.constant 3.200000e+01 : f32
    %81 = vector.broadcast %cst_22 : f32 to vector<16x1xf32>
    %82 = arith.divf %80, %81 : vector<16x1xf32>
    %83 = vector.broadcast %75 : vector<16x1xf32> to vector<16x32xf32>
    %84 = arith.subf %71, %83 : vector<16x32xf32>
    %cst_23 = arith.constant 9.99999974E-6 : f32
    %85 = vector.broadcast %cst_23 : f32 to vector<16x1xf32>
    %86 = arith.addf %82, %85 : vector<16x1xf32>
    %87 = math.rsqrt %86 : vector<16x1xf32>
    %88 = vector.broadcast %87 : vector<16x1xf32> to vector<16x32xf32>
    %89 = arith.mulf %84, %88 : vector<16x32xf32>
    %c0_24 = arith.constant 0 : index
    %c0_25 = arith.constant 0 : index
    %c0_26 = arith.constant 0 : index
    %90 = vector.load %arg10[%c0_24, %c0_25, %c0_26] : memref<1x1x32xf32, #tpu.memory_space<vmem>>, vector<1x1x32xf32>
    %91 = vector.shape_cast %90 : vector<1x1x32xf32> to vector<1x32xf32>
    %92 = vector.broadcast %91 : vector<1x32xf32> to vector<16x32xf32>
    %93 = arith.mulf %89, %92 : vector<16x32xf32>
    %c0_27 = arith.constant 0 : index
    %c0_28 = arith.constant 0 : index
    %c0_29 = arith.constant 0 : index
    %94 = vector.load %arg11[%c0_27, %c0_28, %c0_29] : memref<1x1x32xf32, #tpu.memory_space<vmem>>, vector<1x1x32xf32>
    %95 = vector.shape_cast %94 : vector<1x1x32xf32> to vector<1x32xf32>
    %96 = vector.broadcast %95 : vector<1x32xf32> to vector<16x32xf32>
    %97 = arith.addf %93, %96 : vector<16x32xf32>
    %98 = arith.truncf %97 : vector<16x32xf32> to vector<16x32xbf16>
    %c0_30 = arith.constant 0 : index
    %c0_31 = arith.constant 0 : index
    %c0_32 = arith.constant 0 : index
    %99 = vector.load %arg12[%c0_30, %c0_31, %c0_32] : memref<1x32x128xbf16, #tpu.memory_space<vmem>>, vector<1x32x128xbf16>
    %100 = vector.shape_cast %99 : vector<1x32x128xbf16> to vector<32x128xbf16>
    %cst_33 = arith.constant dense<0.000000e+00> : vector<16x128xf32>
    %101 = tpu.matmul %98, %100, %cst_33 {dimension_numbers = #tpu.dot_dimension_numbers<[1], [0], [0], [1], [0, 0, 1, 1], [], []>} : vector<16x32xbf16>, vector<32x128xbf16>, vector<16x128xf32> -> vector<16x128xf32>
    %c0_34 = arith.constant 0 : index
    %c0_35 = arith.constant 0 : index
    %c0_36 = arith.constant 0 : index
    %102 = vector.load %arg13[%c0_34, %c0_35, %c0_36] : memref<1x1x128xf32, #tpu.memory_space<vmem>>, vector<1x1x128xf32>
    %103 = vector.shape_cast %102 : vector<1x1x128xf32> to vector<1x128xf32>
    %104 = vector.broadcast %103 : vector<1x128xf32> to vector<16x128xf32>
    %105 = arith.addf %101, %104 : vector<16x128xf32>
    %cst_37 = arith.constant 0.000000e+00 : f32
    %106 = vector.broadcast %cst_37 : f32 to vector<16x128xf32>
    %107 = arith.maximumf %105, %106 : vector<16x128xf32>
    %108 = arith.truncf %107 : vector<16x128xf32> to vector<16x128xbf16>
    %c0_38 = arith.constant 0 : index
    %c0_39 = arith.constant 0 : index
    %c0_40 = arith.constant 0 : index
    %109 = vector.load %arg14[%c0_38, %c0_39, %c0_40] : memref<1x128x32xbf16, #tpu.memory_space<vmem>>, vector<1x128x32xbf16>
    %110 = vector.shape_cast %109 : vector<1x128x32xbf16> to vector<128x32xbf16>
    %cst_41 = arith.constant dense<0.000000e+00> : vector<16x32xf32>
    %111 = tpu.matmul %108, %110, %cst_41 {dimension_numbers = #tpu.dot_dimension_numbers<[1], [0], [0], [1], [0, 0, 1, 1], [], []>} : vector<16x128xbf16>, vector<128x32xbf16>, vector<16x32xf32> -> vector<16x32xf32>
    %c0_42 = arith.constant 0 : index
    %c0_43 = arith.constant 0 : index
    %c0_44 = arith.constant 0 : index
    %112 = vector.load %arg15[%c0_42, %c0_43, %c0_44] : memref<1x1x32xf32, #tpu.memory_space<vmem>>, vector<1x1x32xf32>
    %113 = vector.shape_cast %112 : vector<1x1x32xf32> to vector<1x32xf32>
    %114 = vector.broadcast %113 : vector<1x32xf32> to vector<16x32xf32>
    %115 = arith.addf %111, %114 : vector<16x32xf32>
    %116 = arith.addf %97, %115 : vector<16x32xf32>
    %cst_45 = arith.constant dense<0.000000e+00> : vector<16xf32>
    %117 = vector.multi_reduction <add>, %116, %cst_45 [1] : vector<16x32xf32> to vector<16xf32>
    %118 = vector.shape_cast %117 : vector<16xf32> to vector<16x1xf32>
    %cst_46 = arith.constant 3.200000e+01 : f32
    %119 = vector.broadcast %cst_46 : f32 to vector<16x1xf32>
    %120 = arith.divf %118, %119 : vector<16x1xf32>
    %121 = vector.broadcast %120 : vector<16x1xf32> to vector<16x32xf32>
    %122 = arith.subf %116, %121 : vector<16x32xf32>
    %123 = arith.mulf %122, %122 : vector<16x32xf32>
    %cst_47 = arith.constant dense<0.000000e+00> : vector<16xf32>
    %124 = vector.multi_reduction <add>, %123, %cst_47 [1] : vector<16x32xf32> to vector<16xf32>
    %125 = vector.shape_cast %124 : vector<16xf32> to vector<16x1xf32>
    %cst_48 = arith.constant 3.200000e+01 : f32
    %126 = vector.broadcast %cst_48 : f32 to vector<16x1xf32>
    %127 = arith.divf %125, %126 : vector<16x1xf32>
    %128 = vector.broadcast %120 : vector<16x1xf32> to vector<16x32xf32>
    %129 = arith.subf %116, %128 : vector<16x32xf32>
    %cst_49 = arith.constant 9.99999974E-6 : f32
    %130 = vector.broadcast %cst_49 : f32 to vector<16x1xf32>
    %131 = arith.addf %127, %130 : vector<16x1xf32>
    %132 = math.rsqrt %131 : vector<16x1xf32>
    %133 = vector.broadcast %132 : vector<16x1xf32> to vector<16x32xf32>
    %134 = arith.mulf %129, %133 : vector<16x32xf32>
    %c0_50 = arith.constant 0 : index
    %c0_51 = arith.constant 0 : index
    %c0_52 = arith.constant 0 : index
    %135 = vector.load %arg16[%c0_50, %c0_51, %c0_52] : memref<1x1x32xf32, #tpu.memory_space<vmem>>, vector<1x1x32xf32>
    %136 = vector.shape_cast %135 : vector<1x1x32xf32> to vector<1x32xf32>
    %137 = vector.broadcast %136 : vector<1x32xf32> to vector<16x32xf32>
    %138 = arith.mulf %134, %137 : vector<16x32xf32>
    %c0_53 = arith.constant 0 : index
    %c0_54 = arith.constant 0 : index
    %c0_55 = arith.constant 0 : index
    %139 = vector.load %arg17[%c0_53, %c0_54, %c0_55] : memref<1x1x32xf32, #tpu.memory_space<vmem>>, vector<1x1x32xf32>
    %140 = vector.shape_cast %139 : vector<1x1x32xf32> to vector<1x32xf32>
    %141 = vector.broadcast %140 : vector<1x32xf32> to vector<16x32xf32>
    %142 = arith.addf %138, %141 : vector<16x32xf32>
    %c0_56 = arith.constant 0 : index
    %c0_57 = arith.constant 0 : index
    %143 = vector.load %arg23[%c0_56, %c0_57] : memref<16x32xf32, #tpu.memory_space<vmem>>, vector<16x32xf32>
    tpu.vector_store %arg23[%c0_56, %c0_57], %142 {strides = array<i32>} : memref<16x32xf32, #tpu.memory_space<vmem>>, vector<16x32xf32>,
    %c1_i32 = arith.constant 1 : i32
    %144 = arith.cmpi eq, %arg1, %c1_i32 : i32
    %145 = arith.extui %144 : i1 to i32
    %c0_i32_58 = arith.constant 0 : i32
    %146 = arith.cmpi ne, %145, %c0_i32_58 : i32
    scf.if %146 {
      %c7 = arith.constant 7 : index
      %c0_59 = arith.constant 0 : index
      %147 = tpu.strided_load %arg23[%c7, %c0_59] {strides = array<i32: 8, 1>} : memref<16x32xf32, #tpu.memory_space<vmem>>, vector<2x32xf32>
      %c0_60 = arith.constant 0 : index
      %c0_61 = arith.constant 0 : index
      %148 = vector.load %arg18[%c0_60, %c0_61] : memref<32x16xf32, #tpu.memory_space<vmem>>, vector<32x16xf32>
      %cst_62 = arith.constant dense<0.000000e+00> : vector<2x16xf32>
      %149 = tpu.matmul %147, %148, %cst_62 {dimension_numbers = #tpu.dot_dimension_numbers<[1], [0], [0], [1], [0, 0, 1, 1], [], []>} : vector<2x32xf32>, vector<32x16xf32>, vector<2x16xf32> -> vector<2x16xf32>
      %c0_63 = arith.constant 0 : index
      %c0_64 = arith.constant 0 : index
      %150 = vector.load %arg19[%c0_63, %c0_64] : memref<1x16xf32, #tpu.memory_space<vmem>>, vector<1x16xf32>
      %151 = vector.broadcast %150 : vector<1x16xf32> to vector<2x16xf32>
      %152 = arith.addf %149, %151 : vector<2x16xf32>
      %cst_65 = arith.constant 0.000000e+00 : f32
      %153 = vector.broadcast %cst_65 : f32 to vector<2x16xf32>
      %154 = arith.maximumf %152, %153 : vector<2x16xf32>
      %c0_66 = arith.constant 0 : index
      %c0_67 = arith.constant 0 : index
      %155 = vector.load %arg20[%c0_66, %c0_67] : memref<16x3xf32, #tpu.memory_space<vmem>>, vector<16x3xf32>
      %cst_68 = arith.constant dense<0.000000e+00> : vector<2x3xf32>
      %156 = tpu.matmul %154, %155, %cst_68 {dimension_numbers = #tpu.dot_dimension_numbers<[1], [0], [0], [1], [0, 0, 1, 1], [], []>} : vector<2x16xf32>, vector<16x3xf32>, vector<2x3xf32> -> vector<2x3xf32>
      %c0_69 = arith.constant 0 : index
      %c0_70 = arith.constant 0 : index
      %157 = vector.load %arg21[%c0_69, %c0_70] : memref<1x3xf32, #tpu.memory_space<vmem>>, vector<1x3xf32>
      %158 = vector.broadcast %157 : vector<1x3xf32> to vector<2x3xf32>
      %159 = arith.addf %156, %158 : vector<2x3xf32>
      %c0_71 = arith.constant 0 : index
      %c0_72 = arith.constant 0 : index
      %160 = vector.load %arg22[%c0_71, %c0_72] : memref<2x3xf32, #tpu.memory_space<vmem>>, vector<2x3xf32>
      tpu.vector_store %arg22[%c0_71, %c0_72], %159 {strides = array<i32>} : memref<2x3xf32, #tpu.memory_space<vmem>>, vector<2x3xf32>,
    } else {
    }
    return
  }
  func.func @transform_0(%arg0: i32, %arg1: i32) -> (i32, i32) {
    %c0_i32 = arith.constant 0 : i32
    %c0_i32_0 = arith.constant 0 : i32
    return %arg0, %c0_i32 : i32, i32
  }
  func.func @transform_1(%arg0: i32, %arg1: i32) -> (i32, i32) {
    %c0_i32 = arith.constant 0 : i32
    %c0_i32_0 = arith.constant 0 : i32
    %c0_i32_1 = arith.constant 0 : i32
    return %c0_i32, %c0_i32_0 : i32, i32
  }
  func.func @transform_2(%arg0: i32, %arg1: i32) -> (i32, i32) {
    %c0_i32 = arith.constant 0 : i32
    %c0_i32_0 = arith.constant 0 : i32
    %c0_i32_1 = arith.constant 0 : i32
    return %c0_i32, %c0_i32_0 : i32, i32
  }
  func.func @transform_3(%arg0: i32, %arg1: i32) -> (i32, i32) {
    %c0_i32 = arith.constant 0 : i32
    %c0_i32_0 = arith.constant 0 : i32
    %c0_i32_1 = arith.constant 0 : i32
    return %c0_i32, %c0_i32_0 : i32, i32
  }
  func.func @transform_4(%arg0: i32, %arg1: i32) -> (i32, i32, i32) {
    %c0_i32 = arith.constant 0 : i32
    %c0_i32_0 = arith.constant 0 : i32
    %c0_i32_1 = arith.constant 0 : i32
    return %arg1, %c0_i32, %c0_i32_0 : i32, i32, i32
  }
  func.func @transform_5(%arg0: i32, %arg1: i32) -> (i32, i32, i32) {
    %c0_i32 = arith.constant 0 : i32
    %c0_i32_0 = arith.constant 0 : i32
    %c0_i32_1 = arith.constant 0 : i32
    return %arg1, %c0_i32, %c0_i32_0 : i32, i32, i32
  }
  func.func @transform_6(%arg0: i32, %arg1: i32) -> (i32, i32, i32) {
    %c0_i32 = arith.constant 0 : i32
    %c0_i32_0 = arith.constant 0 : i32
    %c0_i32_1 = arith.constant 0 : i32
    return %arg1, %c0_i32, %c0_i32_0 : i32, i32, i32
  }
  func.func @transform_7(%arg0: i32, %arg1: i32) -> (i32, i32, i32) {
    %c0_i32 = arith.constant 0 : i32
    %c0_i32_0 = arith.constant 0 : i32
    %c0_i32_1 = arith.constant 0 : i32
    return %arg1, %c0_i32, %c0_i32_0 : i32, i32, i32
  }
  func.func @transform_8(%arg0: i32, %arg1: i32) -> (i32, i32, i32) {
    %c0_i32 = arith.constant 0 : i32
    %c0_i32_0 = arith.constant 0 : i32
    %c0_i32_1 = arith.constant 0 : i32
    return %arg1, %c0_i32, %c0_i32_0 : i32, i32, i32
  }
  func.func @transform_9(%arg0: i32, %arg1: i32) -> (i32, i32, i32) {
    %c0_i32 = arith.constant 0 : i32
    %c0_i32_0 = arith.constant 0 : i32
    %c0_i32_1 = arith.constant 0 : i32
    return %arg1, %c0_i32, %c0_i32_0 : i32, i32, i32
  }
  func.func @transform_10(%arg0: i32, %arg1: i32) -> (i32, i32, i32) {
    %c0_i32 = arith.constant 0 : i32
    %c0_i32_0 = arith.constant 0 : i32
    %c0_i32_1 = arith.constant 0 : i32
    return %arg1, %c0_i32, %c0_i32_0 : i32, i32, i32
  }
  func.func @transform_11(%arg0: i32, %arg1: i32) -> (i32, i32, i32) {
    %c0_i32 = arith.constant 0 : i32
    %c0_i32_0 = arith.constant 0 : i32
    %c0_i32_1 = arith.constant 0 : i32
    return %arg1, %c0_i32, %c0_i32_0 : i32, i32, i32
  }
  func.func @transform_12(%arg0: i32, %arg1: i32) -> (i32, i32, i32) {
    %c0_i32 = arith.constant 0 : i32
    %c0_i32_0 = arith.constant 0 : i32
    %c0_i32_1 = arith.constant 0 : i32
    return %arg1, %c0_i32, %c0_i32_0 : i32, i32, i32
  }
  func.func @transform_13(%arg0: i32, %arg1: i32) -> (i32, i32, i32) {
    %c0_i32 = arith.constant 0 : i32
    %c0_i32_0 = arith.constant 0 : i32
    %c0_i32_1 = arith.constant 0 : i32
    return %arg1, %c0_i32, %c0_i32_0 : i32, i32, i32
  }
  func.func @transform_14(%arg0: i32, %arg1: i32) -> (i32, i32, i32) {
    %c0_i32 = arith.constant 0 : i32
    %c0_i32_0 = arith.constant 0 : i32
    %c0_i32_1 = arith.constant 0 : i32
    return %arg1, %c0_i32, %c0_i32_0 : i32, i32, i32
  }
  func.func @transform_15(%arg0: i32, %arg1: i32) -> (i32, i32, i32) {
    %c0_i32 = arith.constant 0 : i32
    %c0_i32_0 = arith.constant 0 : i32
    %c0_i32_1 = arith.constant 0 : i32
    return %arg1, %c0_i32, %c0_i32_0 : i32, i32, i32
  }
  func.func @transform_16(%arg0: i32, %arg1: i32) -> (i32, i32) {
    %c0_i32 = arith.constant 0 : i32
    %c0_i32_0 = arith.constant 0 : i32
    %c0_i32_1 = arith.constant 0 : i32
    return %c0_i32, %c0_i32_0 : i32, i32
  }
  func.func @transform_17(%arg0: i32, %arg1: i32) -> (i32, i32) {
    %c0_i32 = arith.constant 0 : i32
    %c0_i32_0 = arith.constant 0 : i32
    %c0_i32_1 = arith.constant 0 : i32
    return %c0_i32, %c0_i32_0 : i32, i32
  }
  func.func @transform_18(%arg0: i32, %arg1: i32) -> (i32, i32) {
    %c0_i32 = arith.constant 0 : i32
    %c0_i32_0 = arith.constant 0 : i32
    %c0_i32_1 = arith.constant 0 : i32
    return %c0_i32, %c0_i32_0 : i32, i32
  }
  func.func @transform_19(%arg0: i32, %arg1: i32) -> (i32, i32) {
    %c0_i32 = arith.constant 0 : i32
    %c0_i32_0 = arith.constant 0 : i32
    %c0_i32_1 = arith.constant 0 : i32
    return %c0_i32, %c0_i32_0 : i32, i32
  }
  func.func @transform_20(%arg0: i32, %arg1: i32) -> (i32, i32) {
    %c0_i32 = arith.constant 0 : i32
    %c0_i32_0 = arith.constant 0 : i32
    return %arg0, %c0_i32 : i32, i32
  }
}

</mosaic_0001>

<bundles_post_ra>
// kernel: trading_transformer_forward.1
= control target key start
LH: loop header
LB: loop body
LE: loop exit
PB: predicated region body
PF: predicated region fallthrough
CT: control target
= control target key end

     0   :  { %s4038_s0 = inlined_call_operand.vmem [shape: f32[16,16], index: 0, kind: input, shape index: {}]   ;;  %s4039_s1 = inlined_call_operand.vmem [shape: f32[8,32], index: 1, kind: input, shape index: {}]   ;;  %s4040_s2 = inlined_call_operand.vmem [shape: f32[16,32], index: 2, kind: input, shape index: {}]   ;;  %s4041_s3 = inlined_call_operand.vmem [shape: f32[1,32], index: 3, kind: input, shape index: {}]   ;;  %s4042_s4 = inlined_call_operand.vmem [shape: bf16[2,32,96], index: 4, kind: input, shape index: {}]   ;;  %s4043_s5 = inlined_call_operand.vmem [shape: f32[2,1,96], index: 5, kind: input, shape index: {}]   ;;  %s4044_s6 = inlined_call_operand.vmem [shape: bf16[2,32,32], index: 6, kind: input, shape index: {}]   ;;  %s4045_s7 = inlined_call_operand.vmem [shape: f32[2,1,32], index: 7, kind: input, shape index: {}]   ;;  %s4046_s8 = inlined_call_operand.vmem [shape: f32[2,1,32], index: 8, kind: input, shape index: {}]   ;;  %s4047_s9 = inlined_call_operand.vmem [shape: f32[2,1,32], index: 9, kind: input, shape index: {}]   ;;  %s4048_s10 = inlined_call_operand.vmem [shape: bf16[2,32,128], index: 10, kind: input, shape index: {}]   ;;  %s4049_s11 = inlined_call_operand.vmem [shape: f32[2,1,128], index: 11, kind: input, shape index: {}]   ;;  %s4050_s12 = inlined_call_operand.vmem [shape: bf16[2,128,32], index: 12, kind: input, shape index: {}]   ;;  %s4051_s13 = inlined_call_operand.vmem [shape: f32[2,1,32], index: 13, kind: input, shape index: {}]   ;;  %s4052_s14 = inlined_call_operand.vmem [shape: f32[2,1,32], index: 14, kind: input, shape index: {}]   ;;  %s4053_s15 = inlined_call_operand.vmem [shape: f32[2,1,32], index: 15, kind: input, shape index: {}]   ;;  %s4054_s16 = inlined_call_operand.vmem [shape: f32[32,16], index: 16, kind: input, shape index: {}]   ;;  %s4055_s17 = inlined_call_operand.vmem [shape: f32[1,16], index: 17, kind: input, shape index: {}]   ;;  %s4056_s18 = inlined_call_operand.vmem [shape: f32[16,3], index: 18, kind: input, shape index: {}]   ;;  %s4057_s19 = inlined_call_operand.vmem [shape: f32[1,3], index: 19, kind: input, shape index: {}]   ;;  %s4058_s20 = inlined_call_operand.hbm [shape: f32[2,3], index: 20, kind: output, shape index: {}]  }
   0x1   :  { %4065 = sst [smem:[#allocation9_spill]] %s4038_s0 }
   0x2   :  { %4066 = sst [smem:[#allocation10_spill]] %s4039_s1 }
   0x3   :  { %4067 = sst [smem:[#allocation11_spill]] %s4040_s2 }
   0x4   :  { %4068 = sst [smem:[#allocation12_spill]] %s4041_s3 }
   0x5   :  { %4069 = sst [smem:[#allocation13_spill]] %s4042_s4 }
   0x6   :  { %4070 = sst [smem:[#allocation14_spill]] %s4044_s6 }
   0x7   :  { %4071 = sst [smem:[#allocation15_spill]] %s4054_s16 }
   0x8   :  { %4072 = sst [smem:[#allocation16_spill]] %s4055_s17 }
   0x9   :  { %4073 = sst [smem:[#allocation17_spill]] %s4056_s18 }
   0xa   :  { %4074 = sst [smem:[#allocation18_spill]] %s4057_s19 }
   0xb   :  { %4075 = sst [smem:[#allocation19_spill]] %s4058_s20 }
   0xc   :  { %25 = vsyncpa [#allocation4], 0  ;;  %s3628_s1 = smov 0   ;;  %s3630_s22 = smov 0  }
   0xd   :  { %s3632_s23 = smov 0  }
   0xe LB: > { %4076 = sst [smem:[#allocation6_spill]] %s3504_s22  ;;  %s40_s2 = sadd.s32 1, %s3504_s22  ;;  %s3508_s23 = sphi %s3632_s23, %s31_s23   ;;  %s3504_s22 = sphi %s3630_s22, %s4100_s22   ;;  %s3500_s1 = sphi %s3628_s1, %s4099_s1  }
   0xf   : > { %4077 = sst [smem:[#allocation7_spill]] %s3508_s23  ;;  %p41_p0 = scmp.ge.s32.totalorder %s40_s2, 2 }
  0x10   : > { %p3060_p1 = scmp.ge.s32.totalorder %s3508_s23, 1  ;;  %p680_p2 = scmp.lt.s32.totalorder %s3508_s23, 3 }
  0x11   : > { %s4102_s2 = smov (%p41_p0, %s40_s2), 0 }
  0x12   : > { %4078 = sst [smem:[#allocation8_spill]] %s4102_s2  ;;  %p681_p3 = pnand %p3060_p1, %p680_p2 }
  0x13   : > { %p783_p4 = scmp.lt.s32.totalorder (!%p681_p3), %s3500_s1, 1  ;;  %s4079_s30 = sld [smem:[#allocation13_spill]] (!%p681_p3) }
  0x14   : > { %684 = sbr.rel (%p681_p3) target bundleno = 3162 (0xc5a), region = 100  ;;  %s4080_s6 = sld [smem:[#allocation14_spill]] (!%p681_p3) }
  0x15   : > { %p3069_p5 = scmp.ne.s32.totalorder (!%p681_p3), %s3500_s1, 0 }
  0x19   : > { %s3651_s25 = scalar_select %p783_p4, %s3500_s1, 1 }
  0x1a   : > { %s4081_s20 = sld [smem:[#allocation11_spill]] (!%p3069_p5) }
  0x1b   : > { %s3131_s3 = sshll.u32 %s3651_s25, 4  ;;  %s3134_s16 = sshll.u32 %s3651_s25, 6 }
  0x1c   : > { %s3661_s0 = scalar_lea.vmem %s4079_s30, %s3131_s3  ;;  %s3666_s2 = scalar_lea.vmem %s4080_s6, %s3131_s3 }
  0x1d   : > { %s3683_s30 = scalar_lea.vmem %s4048_s10, %s3131_s3  ;;  %s812_s6 = scalar_lea.vmem %s4049_s11, %s3651_s25 }
  0x1e   : > { %s3693_s23 = scalar_lea.vmem %s4050_s12, %s3134_s16  ;;  %s823_s4 = scalar_lea.vmem %s4052_s14, %s3651_s25 }
  0x1f   : > { %s826_s18 = scalar_lea.vmem %s4053_s15, %s3651_s25  ;;  %831 = sbr.rel (%p3069_p5) target bundleno = 241 (0xf1), region = 104 }
  0x20   : > { %s4082_s26 = sld [smem:[#allocation9_spill]] (!%p3069_p5) }
  0x21   : > { %s4083_s24 = sld [smem:[#allocation12_spill]] (!%p3069_p5) }
  0x22   : > { %s4084_s22 = sld [smem:[#allocation10_spill]] (!%p3069_p5) }
  0x24   : > { %v835_v0 = vld [vmem:[%s4081_s20 + $0x8] sm:$0xff]  ;;  %v834_v1 = vld [vmem:[%s4081_s20] sm:$0xff]  ;;  %vm843_vm0 = vcmask 130048   ;;  %vm928_vm1 = vcmask 261120  }
  0x25   : > { %3197 = vmatprep.subr.mxu0 %v835_v0 }
  0x26   : > { %v832_v2 = vld [vmem:[%s4082_s26] sm:$0xff]  ;;  %3198 = vmatpush3.msra.mxu0 %v835_v0  ;;  %v833_v3 = vld [vmem:[%s4082_s26 + $0x8] sm:$0xff] }
  0x27   : > { %3201 = vmatprep.mubr.msk.f32.mxu0 %vm843_vm0, %v832_v2  ;;  %3199 = vmatprep.subr.mxu0 %v834_v1  ;;  %v3070_v4 = vld [vmem:[%s4083_s24] ss:$0 sm:$0xff] }
  0x28   : > { %3200 = vmatpush3.msra.mxu0 %v834_v1  ;;  %v925_v6 = vld [vmem:[%s4084_s22] sm:$0xff] }
  0x29   : > { %3202 = vmatmul.mubr.msk.f32.vlgmr.msra.gmra.mxu0 %vm843_vm0, %v833_v3 }
  0xe9   : > { %v3203_v5 = vpop.f32.mrf.mxu0 }
  0xea   : > { %v922_v7 = vadd.f32 %v3203_v5, %v3070_v4 }
  0xeb   : > { %v916_v8 = vpop.f32.mrf.mxu0 }
  0xec   : > { %v927_v9 = vadd.f32 %v925_v6, %v922_v7  ;;  %v917_v10 = vadd.f32 %v3070_v4, %v916_v8 }
  0xee   : > { %930 = vst.msk [vmem:[#allocation2 + $0x8] sm:$0xff] %vm928_vm1, %v927_v9  ;;  %v926_v11 = vadd.f32 %v925_v6, %v917_v10 }
  0xf0   : > { %929 = vst.msk [vmem:[#allocation2] sm:$0xff] %vm928_vm1, %v926_v11 }
  0xf1 PF: > { %v3404_v12 = vld [vmem:[%s3661_s0 + $0x8] sm:$0xff]   ;;  %v3510_v13 = vmov 0.0   ;;  %v3405_v14 = vld [vmem:[%s3661_s0] sm:$0xff]   ;;  %vm3511_vm2 = vmmov 0   ;;  %vm957_vm3 = vcmask 261120   ;;  %s4085_s19 = scalar_lea.vmem %s4043_s5, %s3651_s25  ;;  %s3512_s28 = smov 112  }
  0xf2   : > { %3204 = vmatprep.subr.bf16.mxu0 %v3510_v13  ;;  %3217 = vmatprep.subr.mxu1 %v3510_v13  ;;  %v3073_v18 = vld [vmem:[%s4085_s19] ss:$0 sm:$0xff]  ;;  %s3513_s27 = smov 120   ;;  %s3514_s3 = smov 104   ;;  %vm1018_vm4 = vcmask 64512   ;;  %vm2347_vm5 = vcmask 130048  }
  0xf3   : > { %3205 = vmatpush3.bf16.msra.mxu0 %v3404_v12  ;;  %3208 = vmatprep.mubr.msk.bf16.mxu0 %vm3511_vm2, %v3510_v13  ;;  %s3515_s29 = smov 96   ;;  %s3516_s24 = smov 64   ;;  %vm2350_vm6 = vcmask 195584  }
  0xf4   : > { %3206 = vmatprep.subr.bf16.mxu0 %v3510_v13  ;;  %3219 = vmatprep.mubr.msk.f32.mxu1 %vm3511_vm2, %v3510_v13  ;;  %s3517_s21 = smov 8   ;;  %s3518_s16 = smov 16  }
  0xf5   : > { %v3734_v16 = vld [vmem:[#allocation2 + $0x8] sm:$0xff]  ;;  %s4086_s17 = scalar_lea.vmem %s4045_s7, %s3651_s25  ;;  %p3122_p6 = scmp.ne.s32.totalorder %s3500_s1, 1 }
  0xf6   : > { %s4090_s19 = sld [smem:[#allocation15_spill]] (!%p3122_p6) }
  0xf7   : > { %v3732_v15 = vld [vmem:[#allocation2] sm:$0xff]  ;;  %3207 = vmatpush3.bf16.msra.mxu0 %v3405_v14  ;;  %s4092_s22 = sld [smem:[#allocation16_spill]] (!%p3122_p6) }
  0xf8   : > { %v933_v17 = vpack.c.bf16 %v3734_v16, %v3732_v15  ;;  %3212 = vmatprep.subr.mxu0 %v3510_v13 }
  0xfa   : > { %3209 = vmatmul.mubr.msk.bf16.vlgmr.msra.gmra.mxu0 %vm957_vm3, %v933_v17 }
  0xfb   : > { %3214 = vmatprep.mubr.msk.f32.mxu0 %vm3511_vm2, %v3510_v13 }
 0x1ba   : > { %v995_v19 = vpop.f32.mrf.mxu0 }
 0x1bb   : > { %v3750_v20 = vadd.f32 %v3073_v18, %v995_v19 }
 0x1bc   : > { %v3210_v21 = vpop.f32.mrf.mxu0 }
 0x1bd   : > { %1008 = vrot.lane.b32.xlu1 %v3750_v20, %s3512_s28  ;;  %1004 = vrot.lane.b32.xlu0 %v3750_v20, %s3513_s27 }
 0x1be   : > { %v998_v22 = vpop.f32.mrf.mxu0 }
 0x1bf   : > { %v3754_v23 = vadd.f32 %v3073_v18, %v998_v22 }
 0x1c0   : > { %v3211_v24 = vpop.f32.mrf.mxu0 }
 0x1c1   : > { %1010 = vrot.lane.b32.xlu1 %v3754_v23, %s3512_s28  ;;  %1006 = vrot.lane.b32.xlu0 %v3754_v23, %s3513_s27  ;;  %s4087_s28 = scalar_lea.vmem %s4046_s8, %s3651_s25 }
 0x1c5   : > { %1014 = vrot.lane.b32.xlu1 %v3754_v23, %s3514_s3  ;;  %1012 = vrot.lane.b32.xlu0 %v3750_v20, %s3514_s3 }
 0x1c9   : > { %1093 = vrot.lane.b32.xlu1 %v3754_v23, %s3515_s29  ;;  %1016 = vrot.lane.b32.xlu0 %v3750_v20, %s3515_s29 }
 0x22f   : > { %v3762_v25 = vpop.permute.xlu1 %1008  ;;  %v3764_v26 = vpop.permute.xlu0 %1004 }
 0x230   : > { %1169 = vrot.lane.b32.xlu0 %v3764_v26, %s3515_s29 }
 0x233   : > { %v3767_v27 = vpop.permute.xlu1 %1010  ;;  %v3769_v28 = vpop.permute.xlu0 %1006 }
 0x234   : > { %1321 = vrot.lane.b32.xlu0 %v3762_v25, %s3515_s29  ;;  %1245 = vrot.lane.b32.xlu1 %v3769_v28, %s3515_s29 }
 0x237   : > { %v3773_v29 = vpop.permute.xlu1 %1014  ;;  %v3775_v30 = vpop.permute.xlu0 %1012 }
 0x238   : > { %1397 = vrot.lane.b32.xlu1 %v3767_v27, %s3515_s29  ;;  %1473 = vrot.lane.b32.xlu0 %v3775_v30, %s3515_s29 }
 0x23b   : > { %v1094_v31 = vpop.permute.xlu1 %1093  ;;  %v1017_v32 = vpop.permute.xlu0 %1016 }
 0x23c   : > { %3218 = vmatpush3.xpose.msk.msra.mxu1 %vm1018_vm4, %v1094_v31  ;;  %1549 = vrot.lane.b32.xlu1 %v3773_v29, %s3515_s29  ;;  %s4088_s29 = scalar_lea.vmem %s4047_s9, %s3651_s25 }
 0x23d   : > { %3213 = vmatpush3.xpose.msk.msra.mxu0 %vm1018_vm4, %v1017_v32  ;;  %3222 = vmatprep.subr.mxu1 %v3510_v13 }
 0x23e   : > { %3227 = vmatprep.subr.mxu0 %v3510_v13 }
 0x23f   : > { %3220 = vmatmul.mubr.msk.f32.vlgmr.msra.gmra.mxu1 %vm1018_vm4, %v3754_v23 }
 0x240   : > { %3215 = vmatmul.mubr.msk.f32.vlgmr.msra.gmra.mxu0 %vm1018_vm4, %v3750_v20  ;;  %3224 = vmatprep.mubr.msk.f32.mxu1 %vm3511_vm2, %v3510_v13 }
 0x241   : > { %3229 = vmatprep.mubr.msk.f32.mxu0 %vm3511_vm2, %v3510_v13 }
 0x2a2   : > { %v1170_v33 = vpop.permute.xlu0 %1169 }
 0x2a3   : > { %3223 = vmatpush3.xpose.msk.msra.mxu1 %vm1018_vm4, %v1170_v33 }
 0x2a4   : > { %3232 = vmatprep.subr.mxu1 %v3510_v13 }
 0x2a6   : > { %v1246_v34 = vpop.permute.xlu1 %1245  ;;  %3225 = vmatmul.mubr.msk.f32.vlgmr.msra.gmra.mxu1 %vm1018_vm4, %v3764_v26  ;;  %v1322_v35 = vpop.permute.xlu0 %1321 }
 0x2a7   : > { %3228 = vmatpush3.xpose.msk.msra.mxu0 %vm1018_vm4, %v1246_v34  ;;  %3233 = vmatpush3.xpose.msk.msra.mxu1 %vm1018_vm4, %v1322_v35 }
 0x2a8   : > { %3234 = vmatprep.mubr.msk.f32.mxu1 %vm3511_vm2, %v3510_v13  ;;  %3237 = vmatprep.subr.mxu0 %v3510_v13 }
 0x2a9   : > { %3242 = vmatprep.subr.mxu1 %v3510_v13 }
 0x2aa   : > { %v1398_v36 = vpop.permute.xlu1 %1397  ;;  %3230 = vmatmul.mubr.msk.f32.vlgmr.msra.gmra.mxu0 %vm1018_vm4, %v3769_v28  ;;  %3235 = vmatmul.mubr.msk.f32.vlgmr.msra.gmra.mxu1 %vm1018_vm4, %v3762_v25  ;;  %v1474_v37 = vpop.permute.xlu0 %1473 }
 0x2ab   : > { %3238 = vmatpush3.xpose.msk.msra.mxu0 %vm1018_vm4, %v1398_v36  ;;  %3243 = vmatpush3.xpose.msk.msra.mxu1 %vm1018_vm4, %v1474_v37 }
 0x2ac   : > { %3239 = vmatprep.mubr.msk.f32.mxu0 %vm3511_vm2, %v3510_v13  ;;  %3244 = vmatprep.mubr.msk.f32.mxu1 %vm3511_vm2, %v3510_v13 }
 0x2ad   : > { %3247 = vmatprep.subr.mxu0 %v3510_v13  ;;  %3252 = vmatprep.subr.mxu1 %v3510_v13 }
 0x2ae   : > { %v1550_v38 = vpop.permute.xlu1 %1549  ;;  %3240 = vmatmul.mubr.msk.f32.vlgmr.msra.gmra.mxu0 %vm1018_vm4, %v3767_v27  ;;  %3245 = vmatmul.mubr.msk.f32.vlgmr.msra.gmra.mxu1 %vm1018_vm4, %v3775_v30 }
 0x2af   : > { %3248 = vmatpush3.xpose.msk.msra.mxu0 %vm1018_vm4, %v1550_v38  ;;  %3249 = vmatprep.mubr.msk.f32.mxu0 %vm3511_vm2, %v3510_v13 }
 0x2b0   : > { %3257 = vmatprep.subr.mxu0 %v3510_v13  ;;  %3254 = vmatprep.mubr.msk.f32.mxu1 %vm3511_vm2, %v3510_v13 }
 0x2b2   : > { %3250 = vmatmul.mubr.msk.f32.vlgmr.msra.gmra.mxu0 %vm1018_vm4, %v3773_v29 }
 0x2b3   : > { %3259 = vmatprep.mubr.msk.f32.mxu0 %vm3511_vm2, %v3510_v13 }
 0x2ff   : > { %v1165_v39 = vpop.f32.mrf.mxu1 }
 0x300   : > { %v1089_v40 = vpop.f32.mrf.mxu0  ;;  %v1628_v41 = vsel %vm1018_vm4, %v1165_v39, -inf }
 0x301   : > { %v3221_v42 = vpop.f32.mrf.mxu1  ;;  %1629 = vmax.xlane.f32.xlu1 %v1628_v41  ;;  %v1625_v43 = vsel %vm1018_vm4, %v1089_v40, -inf }
 0x302   : > { %1626 = vmax.xlane.f32.xlu0 %v1625_v43  ;;  %v3216_v44 = vpop.f32.mrf.mxu0 }
 0x366   : > { %v1241_v45 = vpop.f32.mrf.mxu1 }
 0x367   : > { %v1631_v46 = vsel %vm1018_vm4, %v1241_v45, -inf }
 0x368   : > { %v3226_v47 = vpop.f32.mrf.mxu1  ;;  %1632 = vmax.xlane.f32.xlu0 %v1631_v46 }
 0x36a   : > { %v1317_v48 = vpop.f32.mrf.mxu0  ;;  %v1393_v49 = vpop.f32.mrf.mxu1 }
 0x36b   : > { %v1637_v50 = vsel %vm1018_vm4, %v1393_v49, -inf  ;;  %v1634_v51 = vsel %vm1018_vm4, %v1317_v48, -inf }
 0x36c   : > { %1638 = vmax.xlane.f32.xlu1 %v1637_v50  ;;  %v3236_v52 = vpop.f32.mrf.mxu1  ;;  %1635 = vmax.xlane.f32.xlu0 %v1634_v51  ;;  %v3231_v53 = vpop.f32.mrf.mxu0 }
 0x36e   : > { %v1469_v54 = vpop.f32.mrf.mxu0  ;;  %v1545_v55 = vpop.f32.mrf.mxu1 }
 0x36f   : > { %v1643_v56 = vsel %vm1018_vm4, %v1545_v55, -inf  ;;  %v1640_v57 = vsel %vm1018_vm4, %v1469_v54, -inf }
 0x370   : > { %1644 = vmax.xlane.f32.xlu1 %v1643_v56  ;;  %v3246_v58 = vpop.f32.mrf.mxu1  ;;  %1641 = vmax.xlane.f32.xlu0 %v1640_v57  ;;  %v3241_v59 = vpop.f32.mrf.mxu0 }
 0x372   : > { %v1621_v60 = vpop.f32.mrf.mxu0 }
 0x373   : > { %v1646_v61 = vsel %vm1018_vm4, %v1621_v60, -inf }
 0x374   : > { %1647 = vmax.xlane.f32.xlu0 %v1646_v61  ;;  %v3251_v62 = vpop.f32.mrf.mxu0 }
 0x381   : > { %1713 = vrot.lane.b32.xlu1 %v3750_v20, %s3516_s24 }
 0x385   : > { %1865 = vrot.lane.b32.xlu1 %v3764_v26, %s3516_s24 }
 0x389   : > { %1941 = vrot.lane.b32.xlu1 %v3769_v28, %s3516_s24 }
 0x38a   : > { %1789 = vrot.lane.b32.xlu0 %v3754_v23, %s3516_s24  ;;  %v1630_v63 = vpop.xlane.xlu1 %1629 }
 0x38b   : > { %v1650_v0 = vsub.f32 %v1165_v39, %v1630_v63  ;;  %v1627_v1 = vpop.xlane.xlu0 %1626 }
 0x38c   : > { %v1649_v3 = vsub.f32 %v1089_v40, %v1627_v1 }
 0x38d   : > { %2093 = vrot.lane.b32.xlu1 %v3767_v27, %s3516_s24  ;;  %v1659_v2 = vmul.f32 1.442695, %v1650_v0 }
 0x38e   : > { %2017 = vrot.lane.b32.xlu0 %v3762_v25, %s3516_s24  ;;  %v1657_v4 = vmul.f32 1.442695, %v1649_v3 }
 0x38f   : > { %3418 = vpow2.f32 %v1659_v2 }
 0x390   : > { %3420 = vpow2.f32 %v1657_v4 }
 0x39c   : > { %v3848_v5 = vpop.eup %3418 }
 0x39d   : > { %v1676_v6 = vsel %vm1018_vm4, %v3848_v5, 0.0  ;;  %v3852_v7 = vpop.eup %3420 }
 0x39e   : > { %v1673_v8 = vsel %vm1018_vm4, %v3852_v7, 0.0 }
 0x3ad   : > { %1677 = vadd.xlane.f32.xlu0 %v1676_v6 }
 0x3b1   : > { %1674 = vadd.xlane.f32.xlu1 %v1673_v8 }
 0x3f1   : > { %v1633_v9 = vpop.xlane.xlu0 %1632 }
 0x3f2   : > { %v1651_v10 = vsub.f32 %v1241_v45, %v1633_v9 }
 0x3f4   : > { %v1661_v11 = vmul.f32 1.442695, %v1651_v10 }
 0x3f5   : > { %v1639_v12 = vpop.xlane.xlu1 %1638  ;;  %v1636_v14 = vpop.xlane.xlu0 %1635 }
 0x3f6   : > { %3422 = vpow2.f32 %v1661_v11  ;;  %v1653_v17 = vsub.f32 %v1393_v49, %v1639_v12  ;;  %v1652_v18 = vsub.f32 %v1317_v48, %v1636_v14 }
 0x3f8   : > { %v1665_v19 = vmul.f32 1.442695, %v1653_v17  ;;  %v1663_v20 = vmul.f32 1.442695, %v1652_v18  ;;  %v3406_v18 = vld [vmem:[%s3666_s2 + $0x8] sm:$0xff]  }
 0x3f9   : > { %v1645_v21 = vpop.xlane.xlu1 %1644  ;;  %v1642_v22 = vpop.xlane.xlu0 %1641 }
 0x3fa   : > { %3424 = vpow2.f32 %v1665_v19  ;;  %v1655_v23 = vsub.f32 %v1545_v55, %v1645_v21  ;;  %v1654_v24 = vsub.f32 %v1469_v54, %v1642_v22  ;;  %v3407_v21 = vld [vmem:[%s3666_s2] sm:$0xff]   ;;  %s3519_s2 = smov 24  }
 0x3fb   : > { %3426 = vpow2.f32 %v1663_v20 }
 0x3fc   : > { %v1669_v25 = vmul.f32 1.442695, %v1655_v23  ;;  %v1667_v26 = vmul.f32 1.442695, %v1654_v24 }
 0x3fd   : > { %v1714_v27 = vpop.permute.xlu1 %1713  ;;  %v1648_v28 = vpop.xlane.xlu0 %1647 }
 0x3fe   : > { %3428 = vpow2.f32 %v1669_v25  ;;  %v1656_v31 = vsub.f32 %v1621_v60, %v1648_v28  ;;  %3253 = vmatpush3.msra.mxu1 %v1714_v27 }
 0x3ff   : > { %3430 = vpow2.f32 %v1667_v26  ;;  %3262 = vmatprep.subr.mxu1 %v3510_v13 }
 0x400   : > { %v1671_v32 = vmul.f32 1.442695, %v1656_v31 }
 0x401   : > { %v1790_v33 = vpop.permute.xlu0 %1789  ;;  %v1866_v46 = vpop.permute.xlu1 %1865 }
 0x402   : > { %3432 = vpow2.f32 %v1671_v32  ;;  %3258 = vmatpush3.msra.mxu0 %v1790_v33 }
 0x403   : > { %v3423_v34 = vpop.eup %3422  ;;  %3267 = vmatprep.subr.mxu0 %v3510_v13 }
 0x404   : > { %v1679_v35 = vsel %vm1018_vm4, %v3423_v34, 0.0 }
 0x405   : > { %1680 = vadd.xlane.f32.xlu1 %v1679_v35  ;;  %v1942_v47 = vpop.permute.xlu1 %1941  ;;  %v2018_v48 = vpop.permute.xlu0 %2017 }
 0x407   : > { %v3425_v36 = vpop.eup %3424 }
 0x408   : > { %v3427_v37 = vpop.eup %3426  ;;  %v1685_v38 = vsel %vm1018_vm4, %v3425_v36, 0.0 }
 0x409   : > { %1686 = vadd.xlane.f32.xlu1 %v1685_v38  ;;  %v1682_v39 = vsel %vm1018_vm4, %v3427_v37, 0.0  ;;  %v2094_v49 = vpop.permute.xlu1 %2093 }
 0x40a   : > { %1683 = vadd.xlane.f32.xlu0 %v1682_v39 }
 0x40b   : > { %v3429_v40 = vpop.eup %3428 }
 0x40c   : > { %v3861_v41 = vpop.eup %3430  ;;  %v1691_v42 = vsel %vm1018_vm4, %v3429_v40, 0.0 }
 0x40d   : > { %1692 = vadd.xlane.f32.xlu1 %v1691_v42  ;;  %v1688_v43 = vsel %vm1018_vm4, %v3861_v41, 0.0 }
 0x40e   : > { %1689 = vadd.xlane.f32.xlu0 %v1688_v43 }
 0x40f   : > { %v3866_v44 = vpop.eup %3432 }
 0x410   : > { %v1694_v45 = vsel %vm1018_vm4, %v3866_v44, 0.0 }
 0x412   : > { %1695 = vadd.xlane.f32.xlu0 %v1694_v45 }
 0x41e   : > { %2245 = vrot.lane.b32.xlu1 %v3773_v29, %s3516_s24 }
 0x428   : > { %2169 = vrot.lane.b32.xlu0 %v3775_v30, %s3516_s24 }
 0x436   : > { %v1678_v50 = vpop.xlane.xlu0 %1677 }
 0x437   : > { %3434 = vrcp.f32 %v1678_v50 }
 0x43a   : > { %v1675_v51 = vpop.xlane.xlu1 %1674 }
 0x43b   : > { %3436 = vrcp.f32 %v1675_v51 }
 0x444   : > { %v3435_v52 = vpop.eup %3434 }
 0x445   : > { %v1706_v53 = vmul.f32 %v3435_v52, %v3848_v5  ;;  %v3101_v52 = vld [vmem:[%s4086_s17] ss:$0 sm:$0xff] }
 0x447   : > { %3260 = vmatmul.mubr.msk.f32.vlgmr.msra.gmra.mxu0 %vm1018_vm4, %v1706_v53 }
 0x448   : > { %v3437_v54 = vpop.eup %3436  ;;  %3268 = vmatpush3.msra.mxu0 %v1942_v47  ;;  %3269 = vmatprep.mubr.msk.f32.mxu0 %vm3511_vm2, %v3510_v13 }
 0x449   : > { %v1705_v29 = vmul.f32 %v3437_v54, %v3852_v7  ;;  %3277 = vmatprep.subr.mxu0 %v3510_v13 }
 0x44b   : > { %3255 = vmatmul.mubr.msk.f32.vlgmr.msra.gmra.mxu1 %vm1018_vm4, %v1705_v29 }
 0x44c   : > { %3263 = vmatpush3.msra.mxu1 %v1866_v46  ;;  %3264 = vmatprep.mubr.msk.f32.mxu1 %vm3511_vm2, %v3510_v13 }
 0x44d   : > { %3272 = vmatprep.subr.mxu1 %v3510_v13 }
 0x48e   : > { %v1681_v30 = vpop.xlane.xlu1 %1680 }
 0x48f   : > { %3438 = vrcp.f32 %v1681_v30 }
 0x492   : > { %v1687_v55 = vpop.xlane.xlu1 %1686 }
 0x493   : > { %3440 = vrcp.f32 %v1687_v55  ;;  %v1684_v56 = vpop.xlane.xlu0 %1683 }
 0x494   : > { %3442 = vrcp.f32 %v1684_v56 }
 0x496   : > { %v1693_v57 = vpop.xlane.xlu1 %1692 }
 0x497   : > { %3444 = vrcp.f32 %v1693_v57  ;;  %v1690_v58 = vpop.xlane.xlu0 %1689 }
 0x498   : > { %3446 = vrcp.f32 %v1690_v58 }
 0x49a   : > { %v2246_v7 = vpop.permute.xlu1 %2245 }
 0x49b   : > { %v1696_v59 = vpop.xlane.xlu0 %1695 }
 0x49c   : > { %v3439_v60 = vpop.eup %3438  ;;  %3448 = vrcp.f32 %v1696_v59 }
 0x49d   : > { %v1707_v61 = vmul.f32 %v3439_v60, %v3423_v34 }
 0x49f   : > { %3265 = vmatmul.mubr.msk.f32.vlgmr.msra.gmra.mxu1 %vm1018_vm4, %v1707_v61  ;;  %v2170_v2 = vpop.permute.xlu0 %2169 }
 0x4a0   : > { %v3441_v62 = vpop.eup %3440  ;;  %3273 = vmatpush3.msra.mxu1 %v2018_v48  ;;  %3274 = vmatprep.mubr.msk.f32.mxu1 %vm3511_vm2, %v3510_v13 }
 0x4a1   : > { %v3443_v63 = vpop.eup %3442  ;;  %3282 = vmatprep.subr.mxu1 %v3510_v13  ;;  %v1709_v0 = vmul.f32 %v3441_v62, %v3425_v36 }
 0x4a2   : > { %v1708_v1 = vmul.f32 %v3443_v63, %v3427_v37 }
 0x4a3   : > { %3275 = vmatmul.mubr.msk.f32.vlgmr.msra.gmra.mxu1 %vm1018_vm4, %v1709_v0 }
 0x4a4   : > { %v3445_v3 = vpop.eup %3444  ;;  %3270 = vmatmul.mubr.msk.f32.vlgmr.msra.gmra.mxu0 %vm1018_vm4, %v1708_v1  ;;  %3283 = vmatpush3.msra.mxu1 %v2170_v2 }
 0x4a5   : > { %v3447_v4 = vpop.eup %3446  ;;  %3278 = vmatpush3.msra.mxu0 %v2094_v49  ;;  %3279 = vmatprep.mubr.msk.f32.mxu0 %vm3511_vm2, %v3510_v13  ;;  %v1711_v5 = vmul.f32 %v3445_v3, %v3429_v40 }
 0x4a6   : > { %3284 = vmatprep.mubr.msk.f32.mxu1 %vm3511_vm2, %v3510_v13  ;;  %3287 = vmatprep.subr.mxu0 %v3510_v13  ;;  %v1710_v6 = vmul.f32 %v3447_v4, %v3861_v41 }
 0x4a7   : > { %3285 = vmatmul.mubr.msk.f32.vlgmr.msra.gmra.mxu1 %vm1018_vm4, %v1711_v5  ;;  %3308 = vmatprep.subr.bf16.mxu1 %v3510_v13  ;;  %v3408_v5 = vld [vmem:[%s3683_s30 + $0x8] sm:$0xff]  }
 0x4a8   : > { %3280 = vmatmul.mubr.msk.f32.vlgmr.msra.gmra.mxu0 %vm1018_vm4, %v1710_v6  ;;  %3324 = vmatprep.mubr.msk.bf16.mxu1 %vm3511_vm2, %v3510_v13  ;;  %v3409_v6 = vld [vmem:[%s3683_s30] sm:$0xff]  }
 0x4a9   : > { %v3449_v8 = vpop.eup %3448  ;;  %3288 = vmatpush3.msra.mxu0 %v2246_v7  ;;  %3289 = vmatprep.mubr.msk.f32.mxu0 %vm3511_vm2, %v3510_v13  ;;  %v3410_v7 = vld [vmem:[%s3693_s23 + $0x38] sm:$0xff]  }
 0x4aa   : > { %v1712_v9 = vmul.f32 %v3449_v8, %v3866_v44  ;;  %3292 = vmatprep.subr.bf16.mxu0 %v3510_v13  ;;  %3309 = vmatpush3.bf16.msra.mxu1 %v3410_v7  ;;  %v3411_v8 = vld [vmem:[%s3693_s23 + $0x30] sm:$0xff]  }
 0x4ab   : > { %3310 = vmatprep.subr.bf16.mxu1 %v3510_v13 }
 0x4ac   : > { %3290 = vmatmul.mubr.msk.f32.vlgmr.msra.gmra.mxu0 %vm1018_vm4, %v1712_v9  ;;  %v3412_v9 = vld [vmem:[%s3693_s23 + $0x28] sm:$0xff]  }
 0x4ad   : > { %3296 = vmatprep.mubr.msk.bf16.mxu0 %vm3511_vm2, %v3510_v13  ;;  %3293 = vmatpush3.bf16.msra.mxu0 %v3406_v18 }
 0x4ae   : > { %3294 = vmatprep.subr.bf16.mxu0 %v3510_v13  ;;  %3311 = vmatpush3.bf16.msra.mxu1 %v3411_v8  ;;  %v3121_v8 = vld [vmem:[%s826_s18] ss:$0 sm:$0xff] }
 0x4af   : > { %3312 = vmatprep.subr.bf16.mxu1 %v3510_v13 }
 0x4b1   : > { %3295 = vmatpush3.bf16.msra.mxu0 %v3407_v21 }
 0x4b2   : > { %3300 = vmatprep.subr.bf16.mxu0 %v3510_v13  ;;  %3313 = vmatpush3.bf16.msra.mxu1 %v3412_v9 }
 0x4b3   : > { %3314 = vmatprep.subr.bf16.mxu1 %v3510_v13 }
 0x507   : > { %v1861_v10 = vpop.f32.mrf.mxu0 }
 0x509   : > { %v3261_v11 = vpop.f32.mrf.mxu0 }
 0x50a   : > { %v3414_v11 = vld [vmem:[%s3693_s23 + $0x18] sm:$0xff]  }
 0x50b   : > { %v1785_v12 = vpop.f32.mrf.mxu1 }
 0x50d   : > { %v3256_v14 = vpop.f32.mrf.mxu1 }
 0x55f   : > { %v1937_v17 = vpop.f32.mrf.mxu1 }
 0x561   : > { %v3266_v19 = vpop.f32.mrf.mxu1 }
 0x563   : > { %v2089_v20 = vpop.f32.mrf.mxu1 }
 0x564   : > { %v2013_v22 = vpop.f32.mrf.mxu0 }
 0x565   : > { %v3389_v23 = vpack.i.bf16 %v2013_v22, %v1937_v17  ;;  %v3276_v24 = vpop.f32.mrf.mxu1 }
 0x566   : > { %v3271_v25 = vpop.f32.mrf.mxu0 }
 0x567   : > { %3390 = vrot.lane.b32.xlu0 %v3389_v23, %s3517_s21  ;;  %v2241_v26 = vpop.f32.mrf.mxu1  ;;  %v3105_v23 = vld [vmem:[%s4087_s28] ss:$0 sm:$0xff]  ;;  %s4091_s21 = sld [smem:[#allocation17_spill]] (!%p3122_p6) }
 0x568   : > { %v2165_v27 = vpop.f32.mrf.mxu0 }
 0x569   : > { %v3394_v28 = vpack.i.bf16 %v2165_v27, %v2089_v20  ;;  %v3286_v31 = vpop.f32.mrf.mxu1  ;;  %v3106_v27 = vld [vmem:[%s4088_s29] ss:$0 sm:$0xff] }
 0x56a   : > { %v3281_v32 = vpop.f32.mrf.mxu0 }
 0x56b   : > { %3395 = vrot.lane.b32.xlu1 %v3394_v28, %s3518_s16 }
 0x56c   : > { %v2317_v33 = vpop.f32.mrf.mxu0 }
 0x56d   : > { %v3399_v34 = vpack.i.bf16 %v2317_v33, %v2241_v26 }
 0x56e   : > { %v3291_v35 = vpop.f32.mrf.mxu0 }
 0x56f   : > { %3400 = vrot.lane.b32.xlu0 %v3399_v34, %s3519_s2  ;;  %v3415_v34 = vld [vmem:[%s3693_s23 + $0x10] sm:$0xff]   ;;  %v3416_v35 = vld [vmem:[%s3693_s23 + $0x8] sm:$0xff]  }
 0x5d9   : > { %v3391_v36 = vpop.permute.xlu0 %3390 }
 0x5da   : > { %v3393_v38 = vunpack.i.h.bf16 %v3391_v36  ;;  %v3392_v39 = vunpack.i.l.bf16 %v3391_v36  ;;  %v3417_v36 = vld [vmem:[%s3693_s23] sm:$0xff]  }
 0x5dc   : > { %v2346_v43 = vsel %vm1018_vm4, %v1861_v10, %v3393_v38  ;;  %v2345_v44 = vsel %vm1018_vm4, %v1785_v12, %v3392_v39  ;;  %v3413_v10 = vld [vmem:[%s3693_s23 + $0x20] sm:$0xff]   ;;  %s4089_s23 = scalar_lea.vmem %s4051_s13, %s3651_s25 }
 0x5dd   : > { %v3396_v37 = vpop.permute.xlu1 %3395  ;;  %3315 = vmatpush3.bf16.msra.mxu1 %v3413_v10 }
 0x5de   : > { %v3398_v40 = vunpack.i.h.bf16 %v3396_v37  ;;  %v3397_v41 = vunpack.i.l.bf16 %v3396_v37  ;;  %3316 = vmatprep.subr.bf16.mxu1 %v3510_v13  ;;  %v3107_v37 = vld [vmem:[%s812_s6] ss:$0 sm:$0xff] }
 0x5e0   : > { %v2349_v47 = vsel %vm2347_vm5, %v2346_v43, %v3398_v40  ;;  %v2348_v48 = vsel %vm2347_vm5, %v2345_v44, %v3397_v41 }
 0x5e1   : > { %v3401_v42 = vpop.permute.xlu0 %3400  ;;  %3317 = vmatpush3.bf16.msra.mxu1 %v3414_v11 }
 0x5e2   : > { %v3403_v45 = vunpack.i.h.bf16 %v3401_v42  ;;  %v3402_v46 = vunpack.i.l.bf16 %v3401_v42  ;;  %3318 = vmatprep.subr.bf16.mxu1 %v3510_v13 }
 0x5e4   : > { %v2352_v49 = vsel %vm2350_vm6, %v2349_v47, %v3403_v45  ;;  %v2351_v50 = vsel %vm2350_vm6, %v2348_v48, %v3402_v46 }
 0x5e5   : > { %v2353_v51 = vpack.c.bf16 %v2352_v49, %v2351_v50  ;;  %3319 = vmatpush3.bf16.msra.mxu1 %v3415_v34 }
 0x5e6   : > { %3320 = vmatprep.subr.bf16.mxu1 %v3510_v13 }
 0x5e7   : > { %3297 = vmatmul.mubr.msk.bf16.vlgmr.msra.gmra.mxu0 %vm957_vm3, %v2353_v51 }
 0x5e8   : > { %3304 = vmatprep.mubr.msk.bf16.mxu0 %vm3511_vm2, %v3510_v13  ;;  %3301 = vmatpush3.bf16.msra.mxu0 %v3408_v5 }
 0x5e9   : > { %3302 = vmatprep.subr.bf16.mxu0 %v3510_v13  ;;  %3321 = vmatpush3.bf16.msra.mxu1 %v3416_v35 }
 0x5ea   : > { %3322 = vmatprep.subr.bf16.mxu1 %v3510_v13  ;;  %v3111_v13 = vld [vmem:[%s4089_s23] ss:$0 sm:$0xff] }
 0x5ec   : > { %3303 = vmatpush3.bf16.msra.mxu0 %v3409_v6  ;;  %v3120_v6 = vld [vmem:[%s823_s4] ss:$0 sm:$0xff]  ;;  %s4093_s4 = sld [smem:[#allocation18_spill]] (!%p3122_p6) }
 0x5ed   : > { %3323 = vmatpush3.bf16.msra.mxu1 %v3417_v36 }
 0x6a7   : > { %v2414_v53 = vpop.f32.mrf.mxu0 }
 0x6a8   : > { %v2415_v54 = vadd.f32 %v3101_v52, %v2414_v53 }
 0x6a9   : > { %v3298_v29 = vpop.f32.mrf.mxu0 }
 0x6aa   : > { %v2421_v30 = vadd.f32 %v2415_v54, %v3732_v15 }
 0x6ab   : > { %v2417_v55 = vpop.f32.mrf.mxu0 }
 0x6ac   : > { %v2418_v56 = vadd.f32 %v3101_v52, %v2417_v55  ;;  %v2423_v57 = vsel %vm957_vm3, %v2421_v30, 0.0 }
 0x6ad   : > { %2424 = vadd.xlane.f32.xlu1 %v2423_v57  ;;  %v3299_v58 = vpop.f32.mrf.mxu0 }
 0x6ae   : > { %v2422_v59 = vadd.f32 %v2418_v56, %v3734_v16 }
 0x6b0   : > { %v2426_v60 = vsel %vm957_vm3, %v2422_v59, 0.0 }
 0x6b1   : > { %2427 = vadd.xlane.f32.xlu0 %v2426_v60 }
 0x736   : > { %v2425_v61 = vpop.xlane.xlu1 %2424 }
 0x737   : > { %v2430_v62 = vmul.f32 0.03125, %v2425_v61 }
 0x739   : > { %v2432_v63 = vsub.f32 %v2421_v30, %v2430_v62 }
 0x73a   : > { %v2428_v0 = vpop.xlane.xlu0 %2427 }
 0x73b   : > { %v2431_v15 = vmul.f32 0.03125, %v2428_v0  ;;  %v2434_v1 = vmul.f32 %v2432_v63, %v2432_v63 }
 0x73d   : > { %v2433_v2 = vsub.f32 %v2422_v59, %v2431_v15  ;;  %v2436_v3 = vsel %vm957_vm3, %v2434_v1, 0.0 }
 0x73e   : > { %2437 = vadd.xlane.f32.xlu0 %v2436_v3 }
 0x73f   : > { %v2435_v4 = vmul.f32 %v2433_v2, %v2433_v2 }
 0x741   : > { %v2439_v16 = vsel %vm957_vm3, %v2435_v4, 0.0 }
 0x742   : > { %2440 = vadd.xlane.f32.xlu1 %v2439_v16 }
 0x7c7   : > { %v2438_v12 = vpop.xlane.xlu0 %2437 }
 0x7c8   : > { %v2442_v14 = vmul.f32 0.03125, %v2438_v12 }
 0x7ca   : > { %v2444_v17 = vadd.f32 1e-05, %v2442_v14 }
 0x7cb   : > { %v2441_v18 = vpop.xlane.xlu1 %2440 }
 0x7cc   : > { %3450 = vrsqrt.f32 %v2444_v17  ;;  %v2443_v19 = vmul.f32 0.03125, %v2441_v18 }
 0x7ce   : > { %v2445_v20 = vadd.f32 1e-05, %v2443_v19 }
 0x7d0   : > { %3452 = vrsqrt.f32 %v2445_v20 }
 0x7d9   : > { %v3451_v21 = vpop.eup %3450 }
 0x7da   : > { %v2448_v22 = vmul.f32 %v3451_v21, %v2432_v63 }
 0x7dc   : > { %v2457_v26 = vmul.f32 %v3105_v23, %v2448_v22 }
 0x7dd   : > { %v3453_v24 = vpop.eup %3452 }
 0x7de   : > { %v2449_v25 = vmul.f32 %v3453_v24, %v2433_v2  ;;  %v2466_v31 = vadd.f32 %v3106_v27, %v2457_v26 }
 0x7e0   : > { %v2458_v28 = vmul.f32 %v3105_v23, %v2449_v25 }
 0x7e2   : > { %v2467_v32 = vadd.f32 %v3106_v27, %v2458_v28 }
 0x7e4   : > { %v2468_v33 = vpack.c.bf16 %v2467_v32, %v2466_v31 }
 0x7e6   : > { %3305 = vmatmul.mubr.msk.bf16.vlgmr.msra.gmra.mxu0 %vm957_vm3, %v2468_v33 }
 0x8a6   : > { %v2529_v38 = vpop.f32.mrf.mxu0 }
 0x8a7   : > { %v2530_v40 = vadd.f32 %v3107_v37, %v2529_v38 }
 0x8a8   : > { %v3306_v39 = vpop.f32.mrf.mxu0 }
 0x8a9   : > { %v2536_v44 = vmax.f32 %v2530_v40, 0.0 }
 0x8aa   : > { %v2532_v41 = vpop.f32.mrf.mxu0 }
 0x8ab   : > { %v2533_v42 = vadd.f32 %v3107_v37, %v2532_v41 }
 0x8ac   : > { %v3307_v43 = vpop.f32.mrf.mxu0 }
 0x8ad   : > { %v2537_v45 = vmax.f32 %v2533_v42, 0.0 }
 0x8af   : > { %v2538_v46 = vpack.c.bf16 %v2537_v45, %v2536_v44 }
 0x8b1   : > { %3325 = vmatmul.mubr.bf16.vlgmr.msra.gmra.mxu1 %v2538_v46 }
 0x971   : > { %v2644_v47 = vpop.f32.mrf.mxu1 }
 0x972   : > { %v2645_v48 = vadd.f32 %v3111_v13, %v2644_v47 }
 0x973   : > { %v3326_v49 = vpop.f32.mrf.mxu1 }
 0x974   : > { %v2651_v50 = vadd.f32 %v2645_v48, %v2466_v31 }
 0x975   : > { %v2647_v51 = vpop.f32.mrf.mxu1 }
 0x976   : > { %v2648_v52 = vadd.f32 %v3111_v13, %v2647_v51  ;;  %v2653_v53 = vsel %vm957_vm3, %v2651_v50, 0.0 }
 0x977   : > { %2654 = vadd.xlane.f32.xlu0 %v2653_v53  ;;  %v3327_v54 = vpop.f32.mrf.mxu1 }
 0x978   : > { %v2652_v29 = vadd.f32 %v2648_v52, %v2467_v32 }
 0x97a   : > { %v2656_v30 = vsel %vm957_vm3, %v2652_v29, 0.0 }
 0x97b   : > { %2657 = vadd.xlane.f32.xlu1 %v2656_v30 }
 0xa00   : > { %v2655_v55 = vpop.xlane.xlu0 %2654 }
 0xa01   : > { %v2659_v56 = vmul.f32 0.03125, %v2655_v55 }
 0xa03   : > { %v2661_v57 = vsub.f32 %v2651_v50, %v2659_v56 }
 0xa04   : > { %v2658_v58 = vpop.xlane.xlu1 %2657 }
 0xa05   : > { %v2660_v59 = vmul.f32 0.03125, %v2658_v58  ;;  %v2663_v60 = vmul.f32 %v2661_v57, %v2661_v57 }
 0xa07   : > { %v2662_v61 = vsub.f32 %v2652_v29, %v2660_v59  ;;  %v2665_v62 = vsel %vm957_vm3, %v2663_v60, 0.0 }
 0xa08   : > { %2666 = vadd.xlane.f32.xlu0 %v2665_v62 }
 0xa09   : > { %v2664_v63 = vmul.f32 %v2662_v61, %v2662_v61 }
 0xa0b   : > { %v2668_v0 = vsel %vm957_vm3, %v2664_v63, 0.0 }
 0xa0c   : > { %2669 = vadd.xlane.f32.xlu1 %v2668_v0 }
 0xa91   : > { %v2667_v15 = vpop.xlane.xlu0 %2666 }
 0xa92   : > { %v2671_v1 = vmul.f32 0.03125, %v2667_v15 }
 0xa94   : > { %v2673_v2 = vadd.f32 1e-05, %v2671_v1 }
 0xa95   : > { %v2670_v3 = vpop.xlane.xlu1 %2669 }
 0xa96   : > { %3454 = vrsqrt.f32 %v2673_v2  ;;  %v2672_v4 = vmul.f32 0.03125, %v2670_v3 }
 0xa98   : > { %v2674_v16 = vadd.f32 1e-05, %v2672_v4 }
 0xa9a   : > { %3456 = vrsqrt.f32 %v2674_v16 }
 0xaa3   : > { %v3455_v5 = vpop.eup %3454 }
 0xaa4   : > { %v2677_v7 = vmul.f32 %v3455_v5, %v2661_v57 }
 0xaa6   : > { %v2686_v9 = vmul.f32 %v3120_v6, %v2677_v7 }
 0xaa7   : > { %v3457_v10 = vpop.eup %3456 }
 0xaa8   : > { %v2695_v11 = vadd.f32 %v3121_v8, %v2686_v9  ;;  %v2678_v12 = vmul.f32 %v3457_v10, %v2662_v61 }
 0xaaa   : > { %2697 = vst.msk [vmem:[#allocation2] sm:$0xff] %vm957_vm3, %v2695_v11  ;;  %v2687_v14 = vmul.f32 %v3120_v6, %v2678_v12  ;;  %2702 = sbr.rel (%p3122_p6) target bundleno = 3137 (0xc41), region = 108 }
 0xaac   : > { %v2696_v17 = vadd.f32 %v3121_v8, %v2687_v14 }
 0xaae   : > { %2698 = vst.msk [vmem:[#allocation2 + $0x8] sm:$0xff] %vm957_vm3, %v2696_v17 }
 0xaaf   : > { %v2708_v18 = vld [vmem:[%s4090_s19 + $0x18] sm:$0xff]  ;;  %v3520_v19 = vmov 0.0   ;;  %v2707_v20 = vld [vmem:[%s4090_s19 + $0x10] sm:$0xff]  ;;  %vm3521_vm7 = vmmov 0   ;;  %v2706_v21 = vld [vmem:[%s4090_s19 + $0x8] sm:$0xff]  ;;  %vm2872_vm8 = vcmask 17408  }
 0xab0   : > { %3328 = vmatprep.subr.mxu0 %v3520_v19  ;;  %3336 = vmatprep.mubr.msk.f32.mxu0 %vm3521_vm7, %v3520_v19  ;;  %v2705_v22 = vld [vmem:[%s4090_s19] sm:$0xff]  ;;  %v2791_v24 = vld [vmem:[%s4091_s21 + $0x8] sm:$0xff] }
 0xab1   : > { %3329 = vmatpush3.msra.mxu0 %v2708_v18  ;;  %3339 = vmatprep.subr.mxu1 %v3520_v19  ;;  %v2790_v25 = vld [vmem:[%s4091_s21] sm:$0xff] }
 0xab2   : > { %3330 = vmatprep.subr.mxu0 %v3520_v19  ;;  %3343 = vmatprep.mubr.msk.f32.mxu1 %vm3521_vm7, %v3520_v19  ;;  %v3123_v26 = vld [vmem:[%s4092_s22] ss:$0 sm:$0xff] }
 0xab3   : > { %3331 = vmatpush3.msra.mxu0 %v2707_v20  ;;  %3340 = vmatpush3.msra.mxu1 %v2791_v24  ;;  %v3125_v33 = vld [vmem:[%s4093_s4] ss:$0 sm:$0xff] }
 0xab4   : > { %3332 = vmatprep.subr.mxu0 %v3520_v19  ;;  %3341 = vmatprep.subr.mxu1 %v3520_v19 }
 0xab5   : > { %3333 = vmatpush3.msra.mxu0 %v2706_v21  ;;  %v2704_v23 = vld [vmem:[#allocation2 + $0x7] ss:$8 sm:$0x3]  ;;  %3342 = vmatpush3.msra.mxu1 %v2790_v25 }
 0xab6   : > { %3334 = vmatprep.subr.mxu0 %v3520_v19 }
 0xab7   : > { %3335 = vmatpush3.msra.mxu0 %v2705_v22 }
 0xab8   : > { %3337 = vmatmul.mubr.msk.f32.vlgmr.msra.gmra.mxu0 %vm957_vm3, %v2704_v23 }
 0xb78   : > { %v2785_v27 = vpop.f32.mrf.mxu0 }
 0xb79   : > { %v2786_v28 = vadd.f32 %v3123_v26, %v2785_v27 }
 0xb7a   : > { %v3338_v31 = vpop.f32.mrf.mxu0 }
 0xb7b   : > { %v2789_v32 = vmax.f32 %v2786_v28, 0.0 }
 0xb7d   : > { %3344 = vmatmul.mubr.msk.f32.vlgmr.msra.gmra.mxu1 %vm2347_vm5, %v2789_v32 }
 0xc3d   : > { %v2868_v34 = vpop.f32.mrf.mxu1 }
 0xc3e   : > { %v2869_v35 = vadd.f32 %v3125_v33, %v2868_v34 }
 0xc3f   : > { %v3345_v36 = vpop.f32.mrf.mxu1 }
 0xc40   : > { %2873 = vst.msk [vmem:[#allocation3] sm:$0x3] %vm2872_vm8, %v2869_v35 }
 0xc41 PF: > { %s4094_s30 = sld [smem:[#allocation7_spill]]  ;;  %s3522_s28 = smov [#allocation3]  }
 0xc42   : > { %s2883_s27 = sshll.u32 %s3522_s28, 4  ;;  %s2884_s27 = int_to_ptr.vmem [resolvable:$true] %s2883_s27 }
 0xc43   : > { %s3458_s1 = scalar_lea.vmem %s2884_s27, 32  ;;  %p3465_p11 = scmp.lt.s32.totalorder %s2884_s27, %s2884_s27 }
 0xc44   : > { %p3459_p8 = scmp.ne.s32.totalorder %s2884_s27, %s3458_s1  ;;  %p3466_p12 = scmp.lt.s32.totalorder %s3458_s1, %s3458_s1 }
 0xc46   : > { %p3467_p13 = por %p3466_p12, %p3465_p11 }
 0xc47   : > { %s4095_s18 = sadd.s32 4294967295, %s4094_s30  }
 0xc48   : > { %p4014_p7 = scmp.eq.s32.totalorder %s4095_s18, 1 }
 0xc4a   : > { %p3460_p9 = pnand %p3459_p8, %p4014_p7 }
 0xc4c   : > { %p3461_p10 = pneg %p3460_p9 }
 0xc4e   : > { %p3468_p0 = pnand %p3467_p13, %p3461_p10 }
 0xc50   : > { %3471 = shalt.err (!%p3468_p0)
}
 0xc51   : > { %s4097_s24 = sld [smem:[#allocation19_spill]] }
 0xc57   : > { %3347 = dma.vmem_to_hbm [thread:$0]  (%p4014_p7), %s2884_s27, 32, %s4097_s24, [#allocation4]  }
 0xc58   : > { %3495 = dma.done.wait (%p4014_p7), [#allocation4], 32  }
 0xc59   : > { %3497 = vsyncadd (%p4014_p7), [#allocation4], 4294967264 }
 0xc5a PF: > { %s4098_s16 = sld [smem:[#allocation7_spill]] }
 0xc5b   : > { %s4099_s1 = sld [smem:[#allocation6_spill]] }
 0xc5c   : > { %s4100_s22 = sld [smem:[#allocation8_spill]] }
 0xc60   : > { %s31_s23 = sadd.s32 1, %s4098_s16  }
 0xc61   : > { %p28_p1 = scmp.ge.s32.totalorder %s31_s23, 4  }
 0xc63   :  { %30 = sbr.rel (!%p28_p1) target bundleno = 14 (0xe), region = 173 }
 0xc68   :  { %2896 = vsyncpa [#allocation4], 1 }
 0xc69   :  { %2898 = vsyncpa [#allocation4 + $0x1], 1 }

</bundles_post_ra>
